<compile_context>
chip_gen: v7x
topology: tpu7x:2x2x1
jax: 0.10.0
libtpu: 0.0.40
codegen_flags: <defaults>
</compile_context>

<pallas_src>
import jax
import jax.numpy as jnp
from jax.experimental import pallas as pl
from jax.experimental.pallas import tpu as pltpu

# Logical hidden sizes (from the PyTorch module) and lane-padded sizes.
_H1, _H1P = 400, 512
_H2, _H2P = 300, 384


def _round_up(x, m):
    return (x + m - 1) // m * m


def critic_kernel(xu_ref,
                  w1_ref, b1_ref,
                  w2a_ref, w2b_ref, b2a_ref, b2b_ref,
                  w3a_ref, w3b_ref, b3_ref,
                  q_ref):
    """Fused twin-Q MLP on one batch tile.

    Layer 1 : h1  = relu(xu @ W1 + b1)                -> (tb, 1024) [head1 | head2]
    Layer 2 : h2h = relu(h1[:, head] @ W2h + b2h)     -> (tb, 384) per head
    Layer 3 : q   = h2a @ W3a + h2b @ W3b + b3        -> (tb, 2)   [q1 | q2]
    """
    wdt = w1_ref.dtype  # bf16 (or f32); MXU inputs use this dtype

    # Layer 1 — one fused dot over both heads (xu already in weight dtype).
    h1 = jnp.dot(xu_ref[...], w1_ref[...],
                 preferred_element_type=jnp.float32) + b1_ref[...]
    h1 = jnp.maximum(h1, 0.0)                          # f32 elementwise (v5e-safe)

    # Layer 2 — per-head dots on 512-lane-aligned static slices (no relayout,
    # no multiplying the block-diagonal zeros).
    h2a = jnp.dot(h1[:, :_H1P].astype(wdt), w2a_ref[...],
                  preferred_element_type=jnp.float32) + b2a_ref[...]
    h2b = jnp.dot(h1[:, _H1P:].astype(wdt), w2b_ref[...],
                  preferred_element_type=jnp.float32) + b2b_ref[...]
    h2a = jnp.maximum(h2a, 0.0)
    h2b = jnp.maximum(h2b, 0.0)

    # Layer 3 — per-head (384, 2) weights with the off column zero; the sum
    # assembles the lane-fused [q1 | q2] output directly.
    q_ref[...] = (jnp.dot(h2a.astype(wdt), w3a_ref[...],
                          preferred_element_type=jnp.float32)
                  + jnp.dot(h2b.astype(wdt), w3b_ref[...],
                            preferred_element_type=jnp.float32)
                  + b3_ref[...])


def init_critic_params(key, state_dim, action_dim):
    """Unfused, unpadded f32 params mimicking torch.nn.Linear default init.

    Weights stored as (in_features, out_features); biases as (1, out_features).
    """
    dims = [
        ("w1", "b1", state_dim + action_dim, _H1),
        ("w2", "b2", _H1, _H2),
        ("w3", "b3", _H2, 1),
        ("w4", "b4", state_dim + action_dim, _H1),
        ("w5", "b5", _H1, _H2),
        ("w6", "b6", _H2, 1),
    ]
    params = {}
    for wname, bname, fan_in, fan_out in dims:
        key, kw, kb = jax.random.split(key, 3)
        bound = 1.0 / jnp.sqrt(jnp.float32(fan_in))
        params[wname] = jax.random.uniform(kw, (fan_in, fan_out), jnp.float32,
                                           minval=-bound, maxval=bound)
        params[bname] = jax.random.uniform(kb, (1, fan_out), jnp.float32,
                                           minval=-bound, maxval=bound)
    return params


def pack_critic_params(p, state_dim, action_dim, dtype=jnp.bfloat16):
    """Fuse + zero-pad the raw params into the kernel's lane-aligned layout.

    Padded rows/columns and padded bias entries are exactly zero, so padded
    hidden units stay at relu(0) = 0 and never leak across heads/layers.
    """
    kin = state_dim + action_dim

    # Layer 1: both heads side-by-side along the output lanes (400 -> 512 pad).
    w1 = jnp.zeros((kin, 2 * _H1P), jnp.float32)
    w1 = w1.at[:, :_H1].set(p["w1"]).at[:, _H1P:_H1P + _H1].set(p["w4"])
    b1 = jnp.zeros((1, 2 * _H1P), jnp.float32)
    b1 = b1.at[:, :_H1].set(p["b1"]).at[:, _H1P:_H1P + _H1].set(p["b4"])

    # Layer 2: per-head (512, 384) weights, zero-padded from (400, 300).
    def _pad_w2(w):
        return jnp.zeros((_H1P, _H2P), jnp.float32).at[:_H1, :_H2].set(w)

    def _pad_b2(b):
        return jnp.zeros((1, _H2P), jnp.float32).at[:, :_H2].set(b)

    w2a, w2b = _pad_w2(p["w2"]), _pad_w2(p["w5"])
    b2a, b2b = _pad_b2(p["b2"]), _pad_b2(p["b5"])

    # Layer 3: per-head (384, 2); head1 writes column 0, head2 column 1.
    w3a = jnp.zeros((_H2P, 2), jnp.float32).at[:_H2, 0].set(p["w3"][:, 0])
    w3b = jnp.zeros((_H2P, 2), jnp.float32).at[:_H2, 1].set(p["w6"][:, 0])
    b3 = jnp.concatenate([p["b3"], p["b6"]], axis=1)

    return dict(
        w1=w1.astype(dtype),     # (kin, 1024)
        b1=b1,                   # f32 (1, 1024)
        w2a=w2a.astype(dtype),   # (512, 384)
        w2b=w2b.astype(dtype),   # (512, 384)
        b2a=b2a,                 # f32 (1, 384)
        b2b=b2b,                 # f32 (1, 384)
        w3a=w3a.astype(dtype),   # (384, 2)
        w3b=w3b.astype(dtype),   # (384, 2)
        b3=b3.astype(jnp.float32),  # f32 (1, 2)
    )


def critic_forward(x, u, packed, *, block_b=256, vmem_limit_bytes=None):
    """Twin-Q forward: returns (q1, q2), each (batch, 1) f32.

    block_b=256 is safe on all generations; on v6e large-batch workloads pass
    block_b=1024 and vmem_limit_bytes=64<<20 to amortize per-step overhead.
    """
    batch = x.shape[0]
    act_dtype = packed["w1"].dtype

    # Wrapper-side concat (tiny: ~(state+action)*2 bytes/row) + bf16 cast
    # halves activation DMA bytes and removes the per-tile VPU cast.
    xu = jnp.concatenate([x, u], axis=1).astype(act_dtype)
    kin = xu.shape[1]

    # Balanced batch tiling (multiple of 16 sublanes for bf16 packing).
    n = max(1, -(-batch // block_b))          # ceil(batch / block_b)
    if batch >= 512 and n < 2:
        n = 2                                  # v7x: give both TensorCores work
    tb = _round_up(-(-batch // n), 16)
    batch_p = n * tb
    if batch_p != batch:
        xu = jnp.pad(xu, ((0, batch_p - batch), (0, 0)))

    tile = lambda i: (i, 0)      # activations / output: tiled over batch

    def const_spec(shape):
        # Same block every step -> fetched once; single-buffered to save VMEM.
        return pl.BlockSpec(shape, lambda i: (0, 0), pipeline_mode=pl.Buffered(1))

    cp_kwargs = dict(dimension_semantics=("parallel",))  # v7x: shard batch over TCs
    if vmem_limit_bytes is not None:
        cp_kwargs["vmem_limit_bytes"] = vmem_limit_bytes

    q = pl.pallas_call(
        critic_kernel,
        out_shape=jax.ShapeDtypeStruct((batch_p, 2), jnp.float32),
        grid_spec=pltpu.PrefetchScalarGridSpec(
            num_scalar_prefetch=0,
            grid=(n,),
            in_specs=[
                pl.BlockSpec((tb, kin), tile),
                const_spec(packed["w1"].shape),
                const_spec(packed["b1"].shape),
                const_spec(packed["w2a"].shape),
                const_spec(packed["w2b"].shape),
                const_spec(packed["b2a"].shape),
                const_spec(packed["b2b"].shape),
                const_spec(packed["w3a"].shape),
                const_spec(packed["w3b"].shape),
                const_spec(packed["b3"].shape),
            ],
            out_specs=pl.BlockSpec((tb, 2), tile),
        ),
        compiler_params=pltpu.CompilerParams(**cp_kwargs),
    )(xu, packed["w1"], packed["b1"],
      packed["w2a"], packed["w2b"], packed["b2a"], packed["b2b"],
      packed["w3a"], packed["w3b"], packed["b3"])

    q = q[:batch]
    return q[:, 0:1], q[:, 1:2]


def critic_q1(x, u, packed, **kw):
    """Mirrors Critic.Q1 — the fused call already computes both heads."""
    return critic_forward(x, u, packed, **kw)[0]


# ----------------------------- references ---------------------------------

def critic_forward_ref_packed(x, u, packed):
    """Pure-JAX reference using the exact packed (bf16) params the kernel sees."""
    dt = packed["w1"].dtype
    xu = jnp.concatenate([x, u], axis=1).astype(dt)
    h1 = jnp.dot(xu, packed["w1"], preferred_element_type=jnp.float32) + packed["b1"]
    h1 = jnp.maximum(h1, 0.0)
    h2a = jnp.maximum(
        jnp.dot(h1[:, :_H1P].astype(dt), packed["w2a"],
                preferred_element_type=jnp.float32) + packed["b2a"], 0.0)
    h2b = jnp.maximum(
        jnp.dot(h1[:, _H1P:].astype(dt), packed["w2b"],
                preferred_element_type=jnp.float32) + packed["b2b"], 0.0)
    q = (jnp.dot(h2a.astype(dt), packed["w3a"], preferred_element_type=jnp.float32)
         + jnp.dot(h2b.astype(dt), packed["w3b"], preferred_element_type=jnp.float32)
         + packed["b3"])
    return q[:, 0:1], q[:, 1:2]


def critic_forward_ref_f32(x, u, p):
    """Pure-JAX f32 reference of the original (unfused, unpadded) module."""
    xu = jnp.concatenate([x, u], axis=1).astype(jnp.float32)
    h1 = jax.nn.relu(xu @ p["w1"] + p["b1"])
    h1 = jax.nn.relu(h1 @ p["w2"] + p["b2"])
    q1 = h1 @ p["w3"] + p["b3"]
    h2 = jax.nn.relu(xu @ p["w4"] + p["b4"])
    h2 = jax.nn.relu(h2 @ p["w5"] + p["b5"])
    q2 = h2 @ p["w6"] + p["b6"]
    return q1, q2


if __name__ == "__main__":
    state_dim, action_dim, batch = 24, 8, 8

    key = jax.random.PRNGKey(0)
    key, kx, ku = jax.random.split(key, 3)
    x = jax.random.normal(kx, (batch, state_dim), jnp.float32)
    u = jax.random.normal(ku, (batch, action_dim), jnp.float32)

    raw = init_critic_params(key, state_dim, action_dim)
    packed = pack_critic_params(raw, state_dim, action_dim, dtype=jnp.bfloat16)

    q1, q2 = critic_forward(x, u, packed)
    jax.block_until_ready((q1, q2))
    assert q1.shape == (batch, 1) and q2.shape == (batch, 1)

    # Tight check: identical packed bf16 params, plain-JAX math.
    q1_p, q2_p = critic_forward_ref_packed(x, u, packed)
    assert jnp.allclose(q1, q1_p, atol=5e-3, rtol=5e-3)
    assert jnp.allclose(q2, q2_p, atol=5e-3, rtol=5e-3)

    # Loose sanity check against the original f32 module semantics (bf16
    # weights/activations introduce ~1e-2-level differences by design).
    q1_f, q2_f = critic_forward_ref_f32(x, u, raw)
    assert jnp.allclose(q1, q1_f, atol=5e-2, rtol=5e-2)
    assert jnp.allclose(q2, q2_f, atol=5e-2, rtol=5e-2)

    # Q1 path.
    q1_only = critic_q1(x, u, packed)
    jax.block_until_ready(q1_only)
    assert jnp.allclose(q1_only, q1)

    print("KERNEL_OK")
</pallas_src>

<mosaic_0001>
module attributes {stable_mosaic.version = 11 : i64} {
  func.func @critic_kernel(%arg0: i32, %arg1: memref<16x32xbf16, #tpu.memory_space<vmem>>, %arg2: memref<32x1024xbf16, #tpu.memory_space<vmem>>, %arg3: memref<1x1024xf32, #tpu.memory_space<vmem>>, %arg4: memref<512x384xbf16, #tpu.memory_space<vmem>>, %arg5: memref<512x384xbf16, #tpu.memory_space<vmem>>, %arg6: memref<1x384xf32, #tpu.memory_space<vmem>>, %arg7: memref<1x384xf32, #tpu.memory_space<vmem>>, %arg8: memref<384x2xbf16, #tpu.memory_space<vmem>>, %arg9: memref<384x2xbf16, #tpu.memory_space<vmem>>, %arg10: memref<1x2xf32, #tpu.memory_space<vmem>>, %arg11: memref<16x2xf32, #tpu.memory_space<vmem>>) attributes {dimension_semantics = [#tpu.dimension_semantics<parallel>], iteration_bounds = array<i64: 1>, scalar_prefetch = 0 : i64, scratch_operands = 0 : i64, tpu.core_type = #tpu.core_type<tc>, window_params = [{transform_indices = @transform_0, window_bounds = array<i64: 16, 32>}, {pipeline_mode = #tpu.pipeline_mode<synchronous>, transform_indices = @transform_1, window_bounds = array<i64: 32, 1024>}, {pipeline_mode = #tpu.pipeline_mode<synchronous>, transform_indices = @transform_2, window_bounds = array<i64: 1, 1024>}, {pipeline_mode = #tpu.pipeline_mode<synchronous>, transform_indices = @transform_3, window_bounds = array<i64: 512, 384>}, {pipeline_mode = #tpu.pipeline_mode<synchronous>, transform_indices = @transform_4, window_bounds = array<i64: 512, 384>}, {pipeline_mode = #tpu.pipeline_mode<synchronous>, transform_indices = @transform_5, window_bounds = array<i64: 1, 384>}, {pipeline_mode = #tpu.pipeline_mode<synchronous>, transform_indices = @transform_6, window_bounds = array<i64: 1, 384>}, {pipeline_mode = #tpu.pipeline_mode<synchronous>, transform_indices = @transform_7, window_bounds = array<i64: 384, 2>}, {pipeline_mode = #tpu.pipeline_mode<synchronous>, transform_indices = @transform_8, window_bounds = array<i64: 384, 2>}, {pipeline_mode = #tpu.pipeline_mode<synchronous>, transform_indices = @transform_9, window_bounds = array<i64: 1, 2>}, {transform_indices = @transform_10, window_bounds = array<i64: 16, 2>}]} {
    %c0 = arith.constant 0 : index
    %c0_0 = arith.constant 0 : index
    %0 = vector.load %arg1[%c0, %c0_0] : memref<16x32xbf16, #tpu.memory_space<vmem>>, vector<16x32xbf16>
    %c0_1 = arith.constant 0 : index
    %c0_2 = arith.constant 0 : index
    %1 = vector.load %arg2[%c0_1, %c0_2] : memref<32x1024xbf16, #tpu.memory_space<vmem>>, vector<32x1024xbf16>
    %cst = arith.constant dense<0.000000e+00> : vector<16x1024xf32>
    %2 = tpu.matmul %0, %1, %cst {dimension_numbers = #tpu.dot_dimension_numbers<[1], [0], [0], [1], [0, 0, 1, 1], [], []>} : vector<16x32xbf16>, vector<32x1024xbf16>, vector<16x1024xf32> -> vector<16x1024xf32>
    %c0_3 = arith.constant 0 : index
    %c0_4 = arith.constant 0 : index
    %3 = vector.load %arg3[%c0_3, %c0_4] : memref<1x1024xf32, #tpu.memory_space<vmem>>, vector<1x1024xf32>
    %4 = vector.broadcast %3 : vector<1x1024xf32> to vector<16x1024xf32>
    %5 = arith.addf %2, %4 : vector<16x1024xf32>
    %cst_5 = arith.constant 0.000000e+00 : f32
    %6 = vector.broadcast %cst_5 : f32 to vector<16x1024xf32>
    %7 = arith.maximumf %5, %6 : vector<16x1024xf32>
    %8 = vector.extract_strided_slice %7 {offsets = [0, 0], sizes = [16, 512], strides = [1, 1]} : vector<16x1024xf32> to vector<16x512xf32>
    %9 = arith.truncf %8 : vector<16x512xf32> to vector<16x512xbf16>
    %c0_6 = arith.constant 0 : index
    %c0_7 = arith.constant 0 : index
    %10 = vector.load %arg4[%c0_6, %c0_7] : memref<512x384xbf16, #tpu.memory_space<vmem>>, vector<512x384xbf16>
    %cst_8 = arith.constant dense<0.000000e+00> : vector<16x384xf32>
    %11 = tpu.matmul %9, %10, %cst_8 {dimension_numbers = #tpu.dot_dimension_numbers<[1], [0], [0], [1], [0, 0, 1, 1], [], []>} : vector<16x512xbf16>, vector<512x384xbf16>, vector<16x384xf32> -> vector<16x384xf32>
    %c0_9 = arith.constant 0 : index
    %c0_10 = arith.constant 0 : index
    %12 = vector.load %arg6[%c0_9, %c0_10] : memref<1x384xf32, #tpu.memory_space<vmem>>, vector<1x384xf32>
    %13 = vector.broadcast %12 : vector<1x384xf32> to vector<16x384xf32>
    %14 = arith.addf %11, %13 : vector<16x384xf32>
    %15 = vector.extract_strided_slice %7 {offsets = [0, 512], sizes = [16, 512], strides = [1, 1]} : vector<16x1024xf32> to vector<16x512xf32>
    %16 = arith.truncf %15 : vector<16x512xf32> to vector<16x512xbf16>
    %c0_11 = arith.constant 0 : index
    %c0_12 = arith.constant 0 : index
    %17 = vector.load %arg5[%c0_11, %c0_12] : memref<512x384xbf16, #tpu.memory_space<vmem>>, vector<512x384xbf16>
    %cst_13 = arith.constant dense<0.000000e+00> : vector<16x384xf32>
    %18 = tpu.matmul %16, %17, %cst_13 {dimension_numbers = #tpu.dot_dimension_numbers<[1], [0], [0], [1], [0, 0, 1, 1], [], []>} : vector<16x512xbf16>, vector<512x384xbf16>, vector<16x384xf32> -> vector<16x384xf32>
    %c0_14 = arith.constant 0 : index
    %c0_15 = arith.constant 0 : index
    %19 = vector.load %arg7[%c0_14, %c0_15] : memref<1x384xf32, #tpu.memory_space<vmem>>, vector<1x384xf32>
    %20 = vector.broadcast %19 : vector<1x384xf32> to vector<16x384xf32>
    %21 = arith.addf %18, %20 : vector<16x384xf32>
    %cst_16 = arith.constant 0.000000e+00 : f32
    %22 = vector.broadcast %cst_16 : f32 to vector<16x384xf32>
    %23 = arith.maximumf %14, %22 : vector<16x384xf32>
    %cst_17 = arith.constant 0.000000e+00 : f32
    %24 = vector.broadcast %cst_17 : f32 to vector<16x384xf32>
    %25 = arith.maximumf %21, %24 : vector<16x384xf32>
    %26 = arith.truncf %23 : vector<16x384xf32> to vector<16x384xbf16>
    %c0_18 = arith.constant 0 : index
    %c0_19 = arith.constant 0 : index
    %27 = vector.load %arg8[%c0_18, %c0_19] : memref<384x2xbf16, #tpu.memory_space<vmem>>, vector<384x2xbf16>
    %cst_20 = arith.constant dense<0.000000e+00> : vector<16x2xf32>
    %28 = tpu.matmul %26, %27, %cst_20 {dimension_numbers = #tpu.dot_dimension_numbers<[1], [0], [0], [1], [0, 0, 1, 1], [], []>} : vector<16x384xbf16>, vector<384x2xbf16>, vector<16x2xf32> -> vector<16x2xf32>
    %29 = arith.truncf %25 : vector<16x384xf32> to vector<16x384xbf16>
    %c0_21 = arith.constant 0 : index
    %c0_22 = arith.constant 0 : index
    %30 = vector.load %arg9[%c0_21, %c0_22] : memref<384x2xbf16, #tpu.memory_space<vmem>>, vector<384x2xbf16>
    %cst_23 = arith.constant dense<0.000000e+00> : vector<16x2xf32>
    %31 = tpu.matmul %29, %30, %cst_23 {dimension_numbers = #tpu.dot_dimension_numbers<[1], [0], [0], [1], [0, 0, 1, 1], [], []>} : vector<16x384xbf16>, vector<384x2xbf16>, vector<16x2xf32> -> vector<16x2xf32>
    %32 = arith.addf %28, %31 : vector<16x2xf32>
    %c0_24 = arith.constant 0 : index
    %c0_25 = arith.constant 0 : index
    %33 = vector.load %arg10[%c0_24, %c0_25] : memref<1x2xf32, #tpu.memory_space<vmem>>, vector<1x2xf32>
    %34 = vector.broadcast %33 : vector<1x2xf32> to vector<16x2xf32>
    %35 = arith.addf %32, %34 : vector<16x2xf32>
    %c0_26 = arith.constant 0 : index
    %c0_27 = arith.constant 0 : index
    %36 = vector.load %arg11[%c0_26, %c0_27] : memref<16x2xf32, #tpu.memory_space<vmem>>, vector<16x2xf32>
    tpu.vector_store %arg11[%c0_26, %c0_27], %35 {strides = array<i32>} : memref<16x2xf32, #tpu.memory_space<vmem>>, vector<16x2xf32>,
    return
  }
  func.func @transform_0(%arg0: i32) -> (i32, i32) {
    %c0_i32 = arith.constant 0 : i32
    %c0_i32_0 = arith.constant 0 : i32
    return %arg0, %c0_i32 : i32, i32
  }
  func.func @transform_1(%arg0: i32) -> (i32, i32) {
    %c0_i32 = arith.constant 0 : i32
    %c0_i32_0 = arith.constant 0 : i32
    %c0_i32_1 = arith.constant 0 : i32
    return %c0_i32, %c0_i32_0 : i32, i32
  }
  func.func @transform_2(%arg0: i32) -> (i32, i32) {
    %c0_i32 = arith.constant 0 : i32
    %c0_i32_0 = arith.constant 0 : i32
    %c0_i32_1 = arith.constant 0 : i32
    return %c0_i32, %c0_i32_0 : i32, i32
  }
  func.func @transform_3(%arg0: i32) -> (i32, i32) {
    %c0_i32 = arith.constant 0 : i32
    %c0_i32_0 = arith.constant 0 : i32
    %c0_i32_1 = arith.constant 0 : i32
    return %c0_i32, %c0_i32_0 : i32, i32
  }
  func.func @transform_4(%arg0: i32) -> (i32, i32) {
    %c0_i32 = arith.constant 0 : i32
    %c0_i32_0 = arith.constant 0 : i32
    %c0_i32_1 = arith.constant 0 : i32
    return %c0_i32, %c0_i32_0 : i32, i32
  }
  func.func @transform_5(%arg0: i32) -> (i32, i32) {
    %c0_i32 = arith.constant 0 : i32
    %c0_i32_0 = arith.constant 0 : i32
    %c0_i32_1 = arith.constant 0 : i32
    return %c0_i32, %c0_i32_0 : i32, i32
  }
  func.func @transform_6(%arg0: i32) -> (i32, i32) {
    %c0_i32 = arith.constant 0 : i32
    %c0_i32_0 = arith.constant 0 : i32
    %c0_i32_1 = arith.constant 0 : i32
    return %c0_i32, %c0_i32_0 : i32, i32
  }
  func.func @transform_7(%arg0: i32) -> (i32, i32) {
    %c0_i32 = arith.constant 0 : i32
    %c0_i32_0 = arith.constant 0 : i32
    %c0_i32_1 = arith.constant 0 : i32
    return %c0_i32, %c0_i32_0 : i32, i32
  }
  func.func @transform_8(%arg0: i32) -> (i32, i32) {
    %c0_i32 = arith.constant 0 : i32
    %c0_i32_0 = arith.constant 0 : i32
    %c0_i32_1 = arith.constant 0 : i32
    return %c0_i32, %c0_i32_0 : i32, i32
  }
  func.func @transform_9(%arg0: i32) -> (i32, i32) {
    %c0_i32 = arith.constant 0 : i32
    %c0_i32_0 = arith.constant 0 : i32
    %c0_i32_1 = arith.constant 0 : i32
    return %c0_i32, %c0_i32_0 : i32, i32
  }
  func.func @transform_10(%arg0: i32) -> (i32, i32) {
    %c0_i32 = arith.constant 0 : i32
    %c0_i32_0 = arith.constant 0 : i32
    return %arg0, %c0_i32 : i32, i32
  }
}

</mosaic_0001>

<bundles_post_ra>
// kernel: tpu_custom_call.1
= control target key start
LH: loop header
LB: loop body
LE: loop exit
PB: predicated region body
PF: predicated region fallthrough
CT: control target
= control target key end

     0   :  { %15 = vsyncpa [#allocation3], 0  ;;  %s3838_s0 = inlined_call_operand.vmem [shape: bf16[16,32], index: 0, kind: input, shape index: {}]   ;;  %s3839_s1 = inlined_call_operand.vmem [shape: bf16[32,1024], index: 1, kind: input, shape index: {}]   ;;  %s3840_s2 = inlined_call_operand.vmem [shape: f32[1,1024], index: 2, kind: input, shape index: {}]   ;;  %s3841_s3 = inlined_call_operand.hbm [shape: bf16[512,384], index: 3, kind: input, shape index: {}]   ;;  %s3842_s4 = inlined_call_operand.hbm [shape: bf16[512,384], index: 4, kind: input, shape index: {}]   ;;  %s3843_s5 = inlined_call_operand.vmem [shape: f32[1,384], index: 5, kind: input, shape index: {}]   ;;  %s3844_s6 = inlined_call_operand.vmem [shape: f32[1,384], index: 6, kind: input, shape index: {}]   ;;  %s3845_s7 = inlined_call_operand.vmem [shape: bf16[384,2], index: 7, kind: input, shape index: {}]   ;;  %s3846_s8 = inlined_call_operand.vmem [shape: bf16[384,2], index: 8, kind: input, shape index: {}]   ;;  %s3847_s9 = inlined_call_operand.vmem [shape: f32[1,2], index: 9, kind: input, shape index: {}]   ;;  %s3848_s10 = inlined_call_operand.vmem [shape: f32[16,2], index: 10, kind: output, shape index: {}]  }
   0x1   :  { %16 = vsyncpa [#allocation5], 0  ;;  %s3471_s13 = smov [#allocation2]   ;;  %s3423_s17 = scalar_lea.hbm %s3841_s3, 12288 }
   0x2   :  { %s28_s14 = sshll.u32 %s3471_s13, 4  ;;  %p3424_p0 = scmp.ne.s32.totalorder %s3841_s3, %s3423_s17  ;;  %s29_s14 = int_to_ptr.vmem [resolvable:$true] %s28_s14 }
   0x3   :  { %p3427_p1 = scmp.lt.u32.totalorder %s3423_s17, %s3841_s3 }
   0x5   :  { %p3429_p2 = pnand %p3427_p1, %p3424_p0 }
   0x7   :  { %3432 = shalt.err (!%p3429_p2)
}
   0x8   :  { %s3433_s22 = scalar_lea.vmem %s29_s14, 12288  ;;  %p3438_p4 = scmp.lt.s32.totalorder %s29_s14, %s29_s14 }
   0x9   :  { %p3434_p3 = scmp.ne.s32.totalorder %s29_s14, %s3433_s22  ;;  %p3439_p5 = scmp.lt.s32.totalorder %s3433_s22, %s3433_s22 }
   0xb   :  { %p3440_p6 = por %p3439_p5, %p3438_p4 }
   0xd   :  { %p3441_p7 = pnand %p3440_p6, %p3434_p3 }
   0xf   :  { %3444 = shalt.err (!%p3441_p7)
}
  0x10   :  { %s3472_s23 = smov 192   ;;  %s3473_s24 = smov 12  }
  0x11   :  { %34 = dma.hbm_to_vmem [thread:$0]  %s3841_s3, 12288, %s29_s14, [#allocation3], %s3472_s23, %s3472_s23, %s3473_s24  }
  0x12   :  { %s3474_s27 = smov [#allocation4]   ;;  %s3445_s11 = scalar_lea.hbm %s3842_s4, 12288 }
  0x13   :  { %s40_s28 = sshll.u32 %s3474_s27, 4  ;;  %p3446_p8 = scmp.ne.s32.totalorder %s3842_s4, %s3445_s11  ;;  %s41_s28 = int_to_ptr.vmem [resolvable:$true] %s40_s28 }
  0x14   :  { %p3449_p9 = scmp.lt.u32.totalorder %s3445_s11, %s3842_s4 }
  0x16   :  { %p3451_p10 = pnand %p3449_p9, %p3446_p8 }
  0x18   :  { %3454 = shalt.err (!%p3451_p10)
}
  0x19   :  { %s3455_s17 = scalar_lea.vmem %s41_s28, 12288  ;;  %p3460_p12 = scmp.lt.s32.totalorder %s41_s28, %s41_s28 }
  0x1a   :  { %p3456_p11 = scmp.ne.s32.totalorder %s41_s28, %s3455_s17  ;;  %p3461_p13 = scmp.lt.s32.totalorder %s3455_s17, %s3455_s17 }
  0x1c   :  { %p3462_p0 = por %p3461_p13, %p3460_p12 }
  0x1e   :  { %p3463_p1 = pnand %p3462_p0, %p3456_p11 }
  0x20   :  { %3466 = shalt.err (!%p3463_p1)
}
  0x21   :  { %46 = dma.hbm_to_vmem [thread:$0]  %s3842_s4, 12288, %s41_s28, [#allocation5], %s3472_s23, %s3472_s23, %s3473_s24  }
  0x22   :  { %3467 = dma.done.wait [#allocation3], 12288  }
  0x23   :  { %3468 = vsyncadd [#allocation3], 4294955008 }
  0x24   :  { %3469 = dma.done.wait [#allocation5], 12288  }
  0x25   :  { %3470 = vsyncadd [#allocation5], 4294955008  ;;  %v3475_v0 = vmov 0   ;;  %v66_v1 = vld [vmem:[%s3839_s1] sm:$0xff]  ;;  %v67_v8 = vld [vmem:[%s3839_s1 + $0x8] sm:$0xff]  ;;  %vm209_vm0 = vcmask 261120  }
  0x26   :  { %245 = vmatprep.mubr.bf16.mxu0 %v3475_v0  ;;  %288 = vmatprep.mubr.bf16.mxu1 %v3475_v0  ;;  %v70_v2 = vld [vmem:[%s3839_s1 + $0x20] sm:$0xff]  ;;  %v71_v9 = vld [vmem:[%s3839_s1 + $0x28] sm:$0xff]  ;;  %v68_v14 = vld [vmem:[%s3839_s1 + $0x10] sm:$0xff]  ;;  %vm3477_vm1 = vmmov 0   ;;  %vm2634_vm2 = vcmask 15360  }
  0x27   :  { %v74_v3 = vld [vmem:[%s3839_s1 + $0x40] sm:$0xff]  ;;  %v2645_v4 = vcombine.high %v66_v1, %v70_v2  ;;  %v2644_v5 = vcombine.low %v66_v1, %v70_v2  ;;  %v2647_v10 = vcombine.high %v67_v8, %v71_v9  ;;  %v2646_v11 = vcombine.low %v67_v8, %v71_v9  ;;  %v75_v12 = vld [vmem:[%s3839_s1 + $0x48] sm:$0xff]  ;;  %v72_v17 = vld [vmem:[%s3839_s1 + $0x30] sm:$0xff] }
  0x28   :  { %v78_v6 = vld [vmem:[%s3839_s1 + $0x60] sm:$0xff]  ;;  %v79_v13 = vld [vmem:[%s3839_s1 + $0x68] sm:$0xff]  ;;  %v2649_v18 = vcombine.high %v68_v14, %v72_v17  ;;  %v76_v19 = vld [vmem:[%s3839_s1 + $0x50] sm:$0xff]  ;;  %v2648_v26 = vcombine.low %v68_v14, %v72_v17 }
  0x29   :  { %v2653_v7 = vcombine.high %v74_v3, %v78_v6  ;;  %213 = vmatprep.subr.bf16.mxu0 %v2645_v4  ;;  %v2652_v15 = vcombine.low %v74_v3, %v78_v6  ;;  %v2655_v16 = vcombine.high %v75_v12, %v79_v13  ;;  %256 = vmatprep.subr.bf16.mxu1 %v2647_v10  ;;  %v69_v20 = vld [vmem:[%s3839_s1 + $0x18] sm:$0xff]  ;;  %v80_v23 = vld [vmem:[%s3839_s1 + $0x70] sm:$0xff]  ;;  %v3118_v24 = vld [vmem:[%s3838_s0] sm:$0xff]  }
  0x2a   :  { %214 = vmatpush1.bf16.msra.mxu0 %v2644_v5  ;;  %v73_v21 = vld [vmem:[%s3839_s1 + $0x38] sm:$0xff]  ;;  %257 = vmatpush1.bf16.msra.mxu1 %v2646_v11  ;;  %v2654_v22 = vcombine.low %v75_v12, %v79_v13  ;;  %v2657_v29 = vcombine.high %v76_v19, %v80_v23  ;;  %v2656_v32 = vcombine.low %v76_v19, %v80_v23  ;;  %v3121_v33 = vld [vmem:[#allocation2 + $0x4] ss:$12 sps:$4 sm:$0xff]   ;;  %v3119_v35 = vld [vmem:[#allocation2] ss:$12 sps:$4 sm:$0xff]  }
  0x2b   :  { %215 = vmatprep.subr.bf16.mxu0 %v2653_v7  ;;  %258 = vmatprep.subr.bf16.mxu1 %v2655_v16  ;;  %v2651_v25 = vcombine.high %v69_v20, %v73_v21  ;;  %v77_v27 = vld [vmem:[%s3839_s1 + $0x58] sm:$0xff]  ;;  %v2650_v30 = vcombine.low %v69_v20, %v73_v21  ;;  %v3146_v38 = vld [vmem:[#allocation2 + $0xc8] ss:$12 sps:$4 sm:$0xff]   ;;  %v3151_v41 = vld [vmem:[#allocation2 + $0xe0] ss:$12 sps:$4 sm:$0xff]   ;;  %v84_v20 = vlaneseq }
  0x2c   :  { %v81_v28 = vld [vmem:[%s3839_s1 + $0x78] sm:$0xff]  ;;  %v3147_v39 = vld [vmem:[#allocation2 + $0x8] ss:$12 sps:$4 sm:$0xff]   ;;  %v3152_v42 = vld [vmem:[#allocation2 + $0x20] ss:$12 sps:$4 sm:$0xff]  }
  0x2d   :  { %v2659_v31 = vcombine.high %v77_v27, %v81_v28  ;;  %v2658_v34 = vcombine.low %v77_v27, %v81_v28  ;;  %v3124_v36 = vld [vmem:[#allocation2 + $0x1c] ss:$12 sps:$4 sm:$0xff]   ;;  %v3122_v37 = vld [vmem:[#allocation2 + $0x18] ss:$12 sps:$4 sm:$0xff]   ;;  %v3127_v40 = vld [vmem:[#allocation2 + $0x34] ss:$12 sps:$4 sm:$0xff]  }
  0x2e   :  { %216 = vmatpush1.bf16.msra.mxu0 %v2652_v15  ;;  %259 = vmatpush1.bf16.msra.mxu1 %v2654_v22  ;;  %v3125_v43 = vld [vmem:[#allocation2 + $0x30] ss:$12 sps:$4 sm:$0xff]   ;;  %v3130_v44 = vld [vmem:[#allocation2 + $0x4c] ss:$12 sps:$4 sm:$0xff]   ;;  %v3128_v46 = vld [vmem:[#allocation2 + $0x48] ss:$12 sps:$4 sm:$0xff]  }
  0x2f   :  { %299 = vmatprep.subr.bf16.mxu0 %v2649_v18  ;;  %342 = vmatprep.subr.bf16.mxu1 %v2651_v25  ;;  %v3156_v45 = vld [vmem:[#allocation2 + $0xf8] ss:$12 sps:$4 sm:$0xff]   ;;  %v3161_v49 = vld [vmem:[#allocation2 + $0x110] ss:$12 sps:$4 sm:$0xff]   ;;  %v3131_v50 = vld [vmem:[#allocation2 + $0x60] ss:$12 sps:$4 sm:$0xff]  }
  0x30   :  { %v3157_v47 = vld [vmem:[#allocation2 + $0x38] ss:$12 sps:$4 sm:$0xff]   ;;  %v3162_v51 = vld [vmem:[#allocation2 + $0x50] ss:$12 sps:$4 sm:$0xff]   ;;  %v3166_v52 = vld [vmem:[#allocation2 + $0x128] ss:$12 sps:$4 sm:$0xff]  }
  0x31   :  { %2660 = vmatmul.mubr.msk.bf16.vlgmr.msra.gmra.mrb[0].mxu0 %vm209_vm0, %v3118_v24  ;;  %2661 = vmatmul.mubr.msk.bf16.vlgmr.msra.gmra.mrb[0].mxu1 %vm209_vm0, %v3118_v24  ;;  %v3133_v48 = vld [vmem:[#allocation2 + $0x64] ss:$12 sps:$4 sm:$0xff]   ;;  %v3136_v53 = vld [vmem:[#allocation2 + $0x7c] ss:$12 sps:$4 sm:$0xff]   ;;  %v3139_v55 = vld [vmem:[#allocation2 + $0x94] ss:$12 sps:$4 sm:$0xff]  }
  0x32   :  { %300 = vmatpush1.bf16.msra.mxu0 %v2648_v26  ;;  %331 = vmatprep.mubr.bf16.mxu0 %v3475_v0  ;;  %v3134_v54 = vld [vmem:[#allocation2 + $0x78] ss:$12 sps:$4 sm:$0xff]   ;;  %v3167_v56 = vld [vmem:[#allocation2 + $0x68] ss:$12 sps:$4 sm:$0xff]   ;;  %v3171_v57 = vld [vmem:[#allocation2 + $0x140] ss:$12 sps:$4 sm:$0xff]  }
  0x33   :  { %301 = vmatprep.subr.bf16.mxu0 %v2657_v29  ;;  %343 = vmatpush1.bf16.msra.mxu1 %v2650_v30  ;;  %v3172_v58 = vld [vmem:[#allocation2 + $0x80] ss:$12 sps:$4 sm:$0xff]   ;;  %v3137_v59 = vld [vmem:[#allocation2 + $0x90] ss:$12 sps:$4 sm:$0xff]   ;;  %v3140_v61 = vld [vmem:[#allocation2 + $0xa8] ss:$12 sps:$4 sm:$0xff]  }
  0x34   :  { %374 = vmatprep.mubr.bf16.mxu1 %v3475_v0  ;;  %344 = vmatprep.subr.bf16.mxu1 %v2659_v31  ;;  %v3142_v60 = vld [vmem:[#allocation2 + $0xac] ss:$12 sps:$4 sm:$0xff]   ;;  %v3145_v62 = vld [vmem:[#allocation2 + $0xc4] ss:$12 sps:$4 sm:$0xff]   ;;  %v3150_v0 = vld [vmem:[#allocation2 + $0xdc] ss:$12 sps:$4 sm:$0xff]  }
  0x35   :  { %v3143_v63 = vld [vmem:[#allocation2 + $0xc0] ss:$12 sps:$4 sm:$0xff]   ;;  %v3148_v1 = vld [vmem:[#allocation2 + $0xd8] ss:$12 sps:$4 sm:$0xff]   ;;  %v3153_v3 = vld [vmem:[#allocation2 + $0xf0] ss:$12 sps:$4 sm:$0xff]  }
  0x36   :  { %302 = vmatpush1.bf16.msra.mxu0 %v2656_v32  ;;  %v3155_v2 = vld [vmem:[#allocation2 + $0xf4] ss:$12 sps:$4 sm:$0xff]   ;;  %v3160_v4 = vld [vmem:[#allocation2 + $0x10c] ss:$12 sps:$4 sm:$0xff]   ;;  %v3165_v6 = vld [vmem:[#allocation2 + $0x124] ss:$12 sps:$4 sm:$0xff]  }
  0x37   :  { %1062 = vmatprep.subr.bf16.mxu0 %v3121_v33  ;;  %345 = vmatpush1.bf16.msra.mxu1 %v2658_v34  ;;  %v3158_v5 = vld [vmem:[#allocation2 + $0x108] ss:$12 sps:$4 sm:$0xff]   ;;  %v3163_v7 = vld [vmem:[#allocation2 + $0x120] ss:$12 sps:$4 sm:$0xff]   ;;  %v3168_v9 = vld [vmem:[#allocation2 + $0x138] ss:$12 sps:$4 sm:$0xff]  }
  0x38   :  { %2905 = vmatprep.subr.bf16.mxu1 %v3146_v38  ;;  %v3170_v8 = vld [vmem:[#allocation2 + $0x13c] ss:$12 sps:$4 sm:$0xff]   ;;  %v3175_v10 = vld [vmem:[#allocation2 + $0x154] ss:$12 sps:$4 sm:$0xff]   ;;  %v3176_v11 = vld [vmem:[#allocation2 + $0x158] ss:$12 sps:$4 sm:$0xff]  }
  0x39   :  { %2662 = vmatmul.mubr.msk.bf16.vlgmr.msra.gmra.mrb[4].mxu0 %vm209_vm0, %v3118_v24  ;;  %v3173_v12 = vld [vmem:[#allocation2 + $0x150] ss:$12 sps:$4 sm:$0xff]   ;;  %v3177_v13 = vld [vmem:[#allocation2 + $0x98] ss:$12 sps:$4 sm:$0xff]   ;;  %v3178_v16 = vld [vmem:[#allocation2 + $0x168] ss:$12 sps:$4 sm:$0xff]  }
  0x3a   :  { %1063 = vmatpush1.bf16.msra.mxu0 %v3119_v35  ;;  %2663 = vmatmul.mubr.msk.bf16.vlgmr.msra.gmra.mrb[4].mxu1 %vm209_vm0, %v3118_v24  ;;  %v3180_v14 = vld [vmem:[#allocation2 + $0x16c] ss:$12 sps:$4 sm:$0xff]   ;;  %v3181_v15 = vld [vmem:[#allocation2 + $0x170] ss:$12 sps:$4 sm:$0xff]   ;;  %v3186_v19 = vld [vmem:[#allocation2 + $0x248] ss:$12 sps:$4 sm:$0xff]  }
  0x3b   :  { %1064 = vmatprep.subr.bf16.mxu0 %v3124_v36  ;;  %2906 = vmatpush3.bf16.msra.mxu1 %v3147_v39  ;;  %v3182_v17 = vld [vmem:[#allocation2 + $0xb0] ss:$12 sps:$4 sm:$0xff]   ;;  %v85_v21 = vshrl.u32 %v84_v20, 7  ;;  %v82_v23 = vld [vmem:[%s3840_s2] sm:$0xff] }
  0x3c   :  { %2907 = vmatprep.subr.bf16.mxu1 %v3151_v41  ;;  %v3185_v18 = vld [vmem:[#allocation2 + $0x184] ss:$12 sps:$4 sm:$0xff]   ;;  %v3195_v20 = vld [vmem:[#allocation2 + $0x1b4] ss:$12 sps:$4 sm:$0xff]  }
  0x3d   :  { %v3612_v22 = vsub.s32 0, %v85_v21  ;;  %v3617_v24 = vsub.s32 1, %v85_v21  ;;  %v3619_v25 = vsub.s32 2, %v85_v21  ;;  %v98_v26 = vsub.s32 3, %v85_v21 }
  0x3e   :  { %1065 = vmatpush1.bf16.msra.mxu0 %v3122_v37  ;;  %v102_v30 = vsub.s32 4, %v85_v21  ;;  %v106_v33 = vsub.s32 5, %v85_v21 }
  0x3f   :  { %1066 = vmatprep.subr.bf16.mxu0 %v3127_v40  ;;  %2908 = vmatpush3.bf16.msra.mxu1 %v3152_v42  ;;  %v87_v27 = vrot.slane %v82_v23, %v3612_v22  ;;  %v91_v28 = vrot.slane %v82_v23, %v3617_v24  ;;  %v95_v29 = vrot.slane %v82_v23, %v3619_v25 }
  0x40   :  { %2909 = vmatprep.subr.bf16.mxu1 %v3156_v45  ;;  %v99_v32 = vrot.slane %v82_v23, %v98_v26 }
  0x42   :  { %1067 = vmatpush1.bf16.msra.mxu0 %v3125_v43  ;;  %v103_v43 = vrot.slane %v82_v23, %v102_v30 }
  0x43   :  { %1068 = vmatprep.subr.bf16.mxu0 %v3130_v44  ;;  %2910 = vmatpush3.bf16.msra.mxu1 %v3157_v47  ;;  %v110_v44 = vsub.s32 6, %v85_v21 }
  0x44   :  { %2911 = vmatprep.subr.bf16.mxu1 %v3161_v49  ;;  %v114_v49 = vsub.s32 7, %v85_v21 }
  0x46   :  { %1069 = vmatpush1.bf16.msra.mxu0 %v3128_v46 }
  0x47   :  { %1070 = vmatprep.subr.bf16.mxu0 %v3133_v48  ;;  %2912 = vmatpush3.bf16.msra.mxu1 %v3162_v51  ;;  %v107_v48 = vrot.slane %v82_v23, %v106_v33 }
  0x48   :  { %2913 = vmatprep.subr.bf16.mxu1 %v3166_v52 }
  0x4a   :  { %1071 = vmatpush1.bf16.msra.mxu0 %v3131_v50 }
  0x4b   :  { %1072 = vmatprep.subr.bf16.mxu0 %v3136_v53  ;;  %2914 = vmatpush3.bf16.msra.mxu1 %v3167_v56 }
  0x4c   :  { %2915 = vmatprep.subr.bf16.mxu1 %v3171_v57 }
  0x4e   :  { %1073 = vmatpush1.bf16.msra.mxu0 %v3134_v54 }
  0x4f   :  { %1074 = vmatprep.subr.bf16.mxu0 %v3139_v55  ;;  %2916 = vmatpush3.bf16.msra.mxu1 %v3172_v58 }
  0x50   :  { %2917 = vmatprep.subr.bf16.mxu1 %v3176_v11 }
  0x52   :  { %1075 = vmatpush1.bf16.msra.mxu0 %v3137_v59 }
  0x53   :  { %1076 = vmatprep.subr.bf16.mxu0 %v3142_v60  ;;  %2918 = vmatpush3.bf16.msra.mxu1 %v3177_v13  ;;  %v3188_v13 = vld [vmem:[#allocation2 + $0x198] ss:$12 sps:$4 sm:$0xff]  }
  0x54   :  { %2919 = vmatprep.subr.bf16.mxu1 %v3181_v15 }
  0x56   :  { %1077 = vmatpush1.bf16.msra.mxu0 %v3140_v61  ;;  %v111_v61 = vrot.slane %v82_v23, %v110_v44 }
  0x57   :  { %1078 = vmatprep.subr.bf16.mxu0 %v3145_v62  ;;  %2920 = vmatpush3.bf16.msra.mxu1 %v3182_v17 }
  0x58   :  { %2927 = vmatprep.subr.bf16.mxu1 %v3186_v19  ;;  %v3192_v19 = vld [vmem:[#allocation2 + $0x1a0] ss:$12 sps:$4 sm:$0xff]  }
  0x5a   :  { %1079 = vmatpush1.bf16.msra.mxu0 %v3143_v63  ;;  %v3183_v63 = vld [vmem:[#allocation2 + $0x180] ss:$12 sps:$4 sm:$0xff]  }
  0x5b   :  { %1080 = vmatprep.subr.bf16.mxu0 %v3150_v0  ;;  %v3187_v0 = vld [vmem:[#allocation2 + $0x188] ss:$12 sps:$4 sm:$0xff]  }
  0x5e   :  { %1081 = vmatpush1.bf16.msra.mxu0 %v3148_v1 }
  0x5f   :  { %1082 = vmatprep.subr.bf16.mxu0 %v3155_v2 }
  0x62   :  { %1083 = vmatpush1.bf16.msra.mxu0 %v3153_v3  ;;  %v115_v3 = vrot.slane %v82_v23, %v114_v49  ;;  %v3206_v49 = vld [vmem:[#allocation2 + $0x2a8] ss:$12 sps:$4 sm:$0xff]  }
  0x63   :  { %1084 = vmatprep.subr.bf16.mxu0 %v3160_v4  ;;  %v3190_v4 = vld [vmem:[#allocation2 + $0x19c] ss:$12 sps:$4 sm:$0xff]  }
  0x66   :  { %1085 = vmatpush1.bf16.msra.mxu0 %v3158_v5  ;;  %v3191_v5 = vld [vmem:[#allocation2 + $0x260] ss:$12 sps:$4 sm:$0xff]  }
  0x67   :  { %1086 = vmatprep.subr.bf16.mxu0 %v3165_v6 }
  0x6a   :  { %1087 = vmatpush1.bf16.msra.mxu0 %v3163_v7 }
  0x6b   :  { %1088 = vmatprep.subr.bf16.mxu0 %v3170_v8 }
  0x6e   :  { %1089 = vmatpush1.bf16.msra.mxu0 %v3168_v9 }
  0x6f   :  { %1090 = vmatprep.subr.bf16.mxu0 %v3175_v10 }
  0x72   :  { %1091 = vmatpush1.bf16.msra.mxu0 %v3173_v12 }
  0x73   :  { %1092 = vmatprep.subr.bf16.mxu0 %v3180_v14 }
  0x76   :  { %1093 = vmatpush1.bf16.msra.mxu0 %v3178_v16 }
  0x77   :  { %1105 = vmatprep.subr.bf16.mxu0 %v3185_v18 }
 0x104   :  { %v247_v31 = vpop.f32.mrb[0].mxu0  ;;  %v290_v38 = vpop.f32.mrb[0].mxu1 }
 0x105   :  { %v248_v34 = vadd.f32 %v247_v31, %v87_v27  ;;  %v249_v35 = vpop.f32.mrb[1].mxu0  ;;  %v291_v41 = vadd.f32 %v290_v38, %v95_v29  ;;  %v292_v42 = vpop.f32.mrb[1].mxu1  ;;  %v3193_v38 = vld [vmem:[#allocation2 + $0x1b0] ss:$12 sps:$4 sm:$0xff]  }
 0x106   :  { %v250_v36 = vadd.f32 %v249_v35, %v91_v28  ;;  %v251_v37 = vpop.f32.mrb[2].mxu0  ;;  %v293_v46 = vadd.f32 %v292_v42, %v99_v32  ;;  %v294_v47 = vpop.f32.mrb[2].mxu1  ;;  %v3200_v42 = vld [vmem:[#allocation2 + $0x1cc] ss:$12 sps:$4 sm:$0xff]  }
 0x107   :  { %v252_v39 = vadd.f32 %v251_v37, %v87_v27  ;;  %v253_v40 = vpop.f32.mrb[3].mxu0  ;;  %v385_v50 = vmax.f32 %v248_v34, 0.0  ;;  %v387_v52 = vmax.f32 %v291_v41, 0.0  ;;  %v295_v53 = vadd.f32 %v294_v47, %v95_v29  ;;  %v296_v54 = vpop.f32.mrb[3].mxu1  ;;  %v3202_v47 = vld [vmem:[#allocation2 + $0x1d0] ss:$12 sps:$4 sm:$0xff]  }
 0x108   :  { %v254_v45 = vadd.f32 %v253_v40, %v91_v28  ;;  %v386_v55 = vmax.f32 %v250_v36, 0.0  ;;  %v388_v57 = vmax.f32 %v293_v46, 0.0  ;;  %v297_v58 = vadd.f32 %v296_v54, %v99_v32  ;;  %v3196_v28 = vld [vmem:[#allocation2 + $0x278] ss:$12 sps:$4 sm:$0xff]   ;;  %v3198_v46 = vld [vmem:[#allocation2 + $0x1c8] ss:$12 sps:$4 sm:$0xff]  }
 0x109   :  { %v393_v51 = vmax.f32 %v252_v39, 0.0  ;;  %v395_v60 = vmax.f32 %v295_v53, 0.0  ;;  %v3197_v39 = vld [vmem:[#allocation2 + $0x1b8] ss:$12 sps:$4 sm:$0xff]   ;;  %v3211_v53 = vld [vmem:[#allocation2 + $0x2c0] ss:$12 sps:$4 sm:$0xff]  }
 0x10a   :  { %v394_v56 = vmax.f32 %v254_v45, 0.0  ;;  %v396_v1 = vmax.f32 %v297_v58, 0.0  ;;  %v3208_v54 = vld [vmem:[#allocation2 + $0x1f8] ss:$12 sps:$4 sm:$0xff]   ;;  %v3213_v58 = vld [vmem:[#allocation2 + $0x210] ss:$12 sps:$4 sm:$0xff]  }
 0x10b   :  { %v401_v59 = vpack.c.bf16 %v393_v51, %v385_v50  ;;  %v3624_v6 = vpack.c.bf16 %v395_v60, %v387_v52  ;;  %v3203_v50 = vld [vmem:[#allocation2 + $0x1e0] ss:$12 sps:$4 sm:$0xff]   ;;  %v3207_v51 = vld [vmem:[#allocation2 + $0x1e8] ss:$12 sps:$4 sm:$0xff]  }
 0x10c   :  { %v402_v62 = vpack.c.bf16 %v394_v56, %v386_v55  ;;  %v333_v2 = vpop.f32.mrb[4].mxu0  ;;  %v404_v9 = vpack.c.bf16 %v396_v1, %v388_v57  ;;  %v3210_v52 = vld [vmem:[#allocation2 + $0x1fc] ss:$12 sps:$4 sm:$0xff]   ;;  %v3212_v55 = vld [vmem:[#allocation2 + $0x200] ss:$12 sps:$4 sm:$0xff]  }
 0x10d   :  { %v334_v7 = vadd.f32 %v333_v2, %v103_v43  ;;  %v335_v8 = vpop.f32.mrb[5].mxu0  ;;  %v376_v12 = vpop.f32.mrb[4].mxu1  ;;  %v3215_v56 = vld [vmem:[#allocation2 + $0x214] ss:$12 sps:$4 sm:$0xff]   ;;  %v3216_v57 = vld [vmem:[#allocation2 + $0x2d8] ss:$12 sps:$4 sm:$0xff]  }
 0x10e   :  { %1094 = vmatprep.mubr.bf16.mxu0 %v402_v62  ;;  %1180 = vmatprep.mubr.bf16.mxu1 %v402_v62  ;;  %v336_v10 = vadd.f32 %v335_v8, %v107_v48  ;;  %v337_v11 = vpop.f32.mrb[6].mxu0  ;;  %v377_v17 = vadd.f32 %v376_v12, %v111_v61  ;;  %v378_v18 = vpop.f32.mrb[5].mxu1  ;;  %v3220_v60 = vld [vmem:[#allocation2 + $0x22c] ss:$12 sps:$4 sm:$0xff]   ;;  %v3218_v62 = vld [vmem:[#allocation2 + $0x228] ss:$12 sps:$4 sm:$0xff]  }
 0x10f   :  { %1095 = vmatmul.mubr.bf16.vlgmr.msra.gmra.mrb[8].mxu0 %v401_v59  ;;  %1181 = vmatmul.mubr.bf16.vlgmr.msra.gmra.mrb[8].mxu1 %v401_v59  ;;  %v389_v14 = vmax.f32 %v334_v7, 0.0  ;;  %v338_v15 = vadd.f32 %v337_v11, %v103_v43  ;;  %v339_v16 = vpop.f32.mrb[7].mxu0  ;;  %v379_v26 = vadd.f32 %v378_v18, %v115_v3  ;;  %v380_v27 = vpop.f32.mrb[6].mxu1  ;;  %v3201_v43 = vld [vmem:[#allocation2 + $0x290] ss:$12 sps:$4 sm:$0xff]  }
 0x110   :  { %1106 = vmatpush1.bf16.msra.mxu0 %v3183_v63  ;;  %2928 = vmatpush3.bf16.msra.mxu1 %v3187_v0  ;;  %v390_v21 = vmax.f32 %v336_v10, 0.0  ;;  %v340_v23 = vadd.f32 %v339_v16, %v107_v48  ;;  %v391_v30 = vmax.f32 %v377_v17, 0.0  ;;  %v381_v31 = vadd.f32 %v380_v27, %v111_v61  ;;  %v382_v32 = vpop.f32.mrb[7].mxu1  ;;  %v3205_v48 = vld [vmem:[#allocation2 + $0x1e4] ss:$12 sps:$4 sm:$0xff]  }
 0x111   :  { %1107 = vmatprep.subr.bf16.mxu0 %v3190_v4  ;;  %2929 = vmatprep.subr.bf16.mxu1 %v3191_v5  ;;  %v397_v29 = vmax.f32 %v338_v15, 0.0  ;;  %v392_v34 = vmax.f32 %v379_v26, 0.0  ;;  %v383_v35 = vadd.f32 %v382_v32, %v115_v3  ;;  %v3217_v59 = vld [vmem:[#allocation2 + $0x218] ss:$12 sps:$4 sm:$0xff]   ;;  %v3221_v61 = vld [vmem:[#allocation2 + $0x2f0] ss:$12 sps:$4 sm:$0xff]  }
 0x112   :  { %1137 = vmatprep.mubr.bf16.mxu0 %v404_v9  ;;  %1221 = vmatprep.mubr.bf16.mxu1 %v404_v9  ;;  %v398_v33 = vmax.f32 %v340_v23, 0.0  ;;  %v399_v37 = vmax.f32 %v381_v31, 0.0  ;;  %v3222_v63 = vld [vmem:[#allocation2 + $0x230] ss:$12 sps:$4 sm:$0xff]   ;;  %v3223_v2 = vld [vmem:[#allocation2 + $0x240] ss:$12 sps:$4 sm:$0xff]  }
 0x113   :  { %v3626_v36 = vpack.c.bf16 %v397_v29, %v389_v14  ;;  %v400_v41 = vmax.f32 %v383_v35, 0.0  ;;  %v3225_v0 = vld [vmem:[#allocation2 + $0x244] ss:$12 sps:$4 sm:$0xff]   ;;  %v3226_v3 = vld [vmem:[#allocation4] ss:$12 sps:$4 sm:$0xff]  }
 0x114   :  { %1108 = vmatpush1.bf16.msra.mxu0 %v3188_v13  ;;  %2930 = vmatpush3.bf16.msra.mxu1 %v3192_v19  ;;  %v3628_v40 = vpack.c.bf16 %v398_v33, %v390_v21  ;;  %v3630_v44 = vpack.c.bf16 %v399_v37, %v391_v30  ;;  %v3228_v1 = vld [vmem:[#allocation4 + $0x4] ss:$12 sps:$4 sm:$0xff]   ;;  %v3231_v4 = vld [vmem:[#allocation2 + $0x25c] ss:$12 sps:$4 sm:$0xff]   ;;  %v3237_v9 = vld [vmem:[#allocation2 + $0x274] ss:$12 sps:$4 sm:$0xff]  }
 0x115   :  { %1109 = vmatprep.subr.bf16.mxu0 %v3195_v20  ;;  %2931 = vmatprep.subr.bf16.mxu1 %v3196_v28  ;;  %v3632_v45 = vpack.c.bf16 %v400_v41, %v392_v34  ;;  %v3234_v5 = vld [vmem:[#allocation4 + $0x1c] ss:$12 sps:$4 sm:$0xff]   ;;  %v3229_v7 = vld [vmem:[#allocation2 + $0x258] ss:$12 sps:$4 sm:$0xff]   ;;  %v3240_v10 = vld [vmem:[#allocation4 + $0x34] ss:$12 sps:$4 sm:$0xff]  }
 0x116   :  { %v3232_v8 = vld [vmem:[#allocation4 + $0x18] ss:$12 sps:$4 sm:$0xff]   ;;  %v3235_v11 = vld [vmem:[#allocation2 + $0x270] ss:$12 sps:$4 sm:$0xff]   ;;  %v3241_v15 = vld [vmem:[#allocation2 + $0x288] ss:$12 sps:$4 sm:$0xff]  }
 0x117   :  { %v3238_v12 = vld [vmem:[#allocation4 + $0x30] ss:$12 sps:$4 sm:$0xff]   ;;  %v3243_v13 = vld [vmem:[#allocation2 + $0x28c] ss:$12 sps:$4 sm:$0xff]   ;;  %v3244_v16 = vld [vmem:[#allocation4 + $0x48] ss:$12 sps:$4 sm:$0xff]  }
 0x118   :  { %1110 = vmatpush1.bf16.msra.mxu0 %v3193_v38  ;;  %2932 = vmatpush3.bf16.msra.mxu1 %v3197_v39  ;;  %v3246_v14 = vld [vmem:[#allocation4 + $0x4c] ss:$12 sps:$4 sm:$0xff]   ;;  %v3249_v17 = vld [vmem:[#allocation2 + $0x2a4] ss:$12 sps:$4 sm:$0xff]   ;;  %v3255_v21 = vld [vmem:[#allocation2 + $0x2bc] ss:$12 sps:$4 sm:$0xff]  }
 0x119   :  { %1111 = vmatprep.subr.bf16.mxu0 %v3200_v42  ;;  %2933 = vmatprep.subr.bf16.mxu1 %v3201_v43  ;;  %v3252_v18 = vld [vmem:[#allocation4 + $0x64] ss:$12 sps:$4 sm:$0xff]   ;;  %v3247_v19 = vld [vmem:[#allocation2 + $0x2a0] ss:$12 sps:$4 sm:$0xff]   ;;  %v3258_v23 = vld [vmem:[#allocation4 + $0x7c] ss:$12 sps:$4 sm:$0xff]  }
 0x11a   :  { %v3250_v20 = vld [vmem:[#allocation4 + $0x60] ss:$12 sps:$4 sm:$0xff]   ;;  %v3253_v26 = vld [vmem:[#allocation2 + $0x2b8] ss:$12 sps:$4 sm:$0xff]   ;;  %v3259_v30 = vld [vmem:[#allocation2 + $0x2d0] ss:$12 sps:$4 sm:$0xff]  }
 0x11b   :  { %v3256_v27 = vld [vmem:[#allocation4 + $0x78] ss:$12 sps:$4 sm:$0xff]   ;;  %v3261_v28 = vld [vmem:[#allocation2 + $0x2d4] ss:$12 sps:$4 sm:$0xff]   ;;  %v3262_v31 = vld [vmem:[#allocation4 + $0x90] ss:$12 sps:$4 sm:$0xff]  }
 0x11c   :  { %1112 = vmatpush1.bf16.msra.mxu0 %v3198_v46  ;;  %2934 = vmatpush3.bf16.msra.mxu1 %v3202_v47  ;;  %v3264_v29 = vld [vmem:[#allocation4 + $0x94] ss:$12 sps:$4 sm:$0xff]   ;;  %v3267_v32 = vld [vmem:[#allocation2 + $0x2ec] ss:$12 sps:$4 sm:$0xff]   ;;  %v3273_v37 = vld [vmem:[#allocation4 + $0xc4] ss:$12 sps:$4 sm:$0xff]  }
 0x11d   :  { %1113 = vmatprep.subr.bf16.mxu0 %v3205_v48  ;;  %2935 = vmatprep.subr.bf16.mxu1 %v3206_v49  ;;  %v3270_v33 = vld [vmem:[#allocation4 + $0xac] ss:$12 sps:$4 sm:$0xff]   ;;  %v3265_v34 = vld [vmem:[#allocation2 + $0x2e8] ss:$12 sps:$4 sm:$0xff]  }
 0x11e   :  { %v3268_v35 = vld [vmem:[#allocation4 + $0xa8] ss:$12 sps:$4 sm:$0xff]   ;;  %v3271_v39 = vld [vmem:[#allocation4 + $0xc0] ss:$12 sps:$4 sm:$0xff]   ;;  %v3276_v46 = vld [vmem:[#allocation4 + $0xd8] ss:$12 sps:$4 sm:$0xff]  }
 0x11f   :  { %v3274_v38 = vld [vmem:[#allocation4 + $0xc8] ss:$12 sps:$4 sm:$0xff]   ;;  %v3279_v43 = vld [vmem:[#allocation4 + $0xe0] ss:$12 sps:$4 sm:$0xff]   ;;  %v3284_v49 = vld [vmem:[#allocation4 + $0xf8] ss:$12 sps:$4 sm:$0xff]  }
 0x120   :  { %1114 = vmatpush1.bf16.msra.mxu0 %v3203_v50  ;;  %2936 = vmatpush3.bf16.msra.mxu1 %v3207_v51  ;;  %v3275_v41 = vld [vmem:[#allocation4 + $0x8] ss:$12 sps:$4 sm:$0xff]   ;;  %v3280_v47 = vld [vmem:[#allocation4 + $0x20] ss:$12 sps:$4 sm:$0xff]   ;;  %v3281_v50 = vld [vmem:[#allocation4 + $0xf0] ss:$12 sps:$4 sm:$0xff]  }
 0x121   :  { %1115 = vmatprep.subr.bf16.mxu0 %v3210_v52  ;;  %2937 = vmatprep.subr.bf16.mxu1 %v3211_v53  ;;  %v3278_v42 = vld [vmem:[#allocation4 + $0xdc] ss:$12 sps:$4 sm:$0xff]   ;;  %v3283_v48 = vld [vmem:[#allocation4 + $0xf4] ss:$12 sps:$4 sm:$0xff]   ;;  %v3285_v51 = vld [vmem:[#allocation4 + $0x38] ss:$12 sps:$4 sm:$0xff]  }
 0x122   :  { %v3288_v52 = vld [vmem:[#allocation4 + $0x10c] ss:$12 sps:$4 sm:$0xff]   ;;  %v3289_v53 = vld [vmem:[#allocation4 + $0x110] ss:$12 sps:$4 sm:$0xff]  }
 0x124   :  { %1116 = vmatpush1.bf16.msra.mxu0 %v3208_v54  ;;  %2938 = vmatpush3.bf16.msra.mxu1 %v3212_v55  ;;  %v3290_v54 = vld [vmem:[#allocation4 + $0x50] ss:$12 sps:$4 sm:$0xff]  }
 0x125   :  { %1117 = vmatprep.subr.bf16.mxu0 %v3215_v56  ;;  %2939 = vmatprep.subr.bf16.mxu1 %v3216_v57  ;;  %v3293_v55 = vld [vmem:[#allocation4 + $0x124] ss:$12 sps:$4 sm:$0xff]   ;;  %v3294_v56 = vld [vmem:[#allocation4 + $0x128] ss:$12 sps:$4 sm:$0xff]   ;;  %v3291_v57 = vld [vmem:[#allocation4 + $0x120] ss:$12 sps:$4 sm:$0xff]  }
 0x128   :  { %1118 = vmatpush1.bf16.msra.mxu0 %v3213_v58  ;;  %2940 = vmatpush3.bf16.msra.mxu1 %v3217_v59  ;;  %v3298_v58 = vld [vmem:[#allocation4 + $0x13c] ss:$12 sps:$4 sm:$0xff]   ;;  %v3299_v59 = vld [vmem:[#allocation4 + $0x140] ss:$12 sps:$4 sm:$0xff]  }
 0x129   :  { %1119 = vmatprep.subr.bf16.mxu0 %v3220_v60  ;;  %2941 = vmatprep.subr.bf16.mxu1 %v3221_v61  ;;  %v3296_v60 = vld [vmem:[#allocation4 + $0x138] ss:$12 sps:$4 sm:$0xff]   ;;  %v3300_v61 = vld [vmem:[#allocation4 + $0x80] ss:$12 sps:$4 sm:$0xff]  }
 0x12c   :  { %1120 = vmatpush1.bf16.msra.mxu0 %v3218_v62  ;;  %2942 = vmatpush3.bf16.msra.mxu1 %v3222_v63  ;;  %v3303_v62 = vld [vmem:[#allocation4 + $0x154] ss:$12 sps:$4 sm:$0xff]   ;;  %v3304_v63 = vld [vmem:[#allocation4 + $0x158] ss:$12 sps:$4 sm:$0xff]  }
 0x12d   :  { %1121 = vmatprep.subr.bf16.mxu0 %v3225_v0  ;;  %1891 = vmatprep.subr.bf16.mxu1 %v3228_v1  ;;  %v3301_v0 = vld [vmem:[#allocation4 + $0x150] ss:$12 sps:$4 sm:$0xff]   ;;  %v3305_v1 = vld [vmem:[#allocation4 + $0x98] ss:$12 sps:$4 sm:$0xff]  }
 0x12f   :  { %1222 = vmatmul.mubr.bf16.vlgmr.msra.gmra.mrb[12].mxu1 %v3624_v6 }
 0x130   :  { %1122 = vmatpush1.bf16.msra.mxu0 %v3223_v2  ;;  %1892 = vmatpush1.bf16.msra.mxu1 %v3226_v3  ;;  %v3308_v2 = vld [vmem:[#allocation4 + $0x16c] ss:$12 sps:$4 sm:$0xff]   ;;  %v3309_v3 = vld [vmem:[#allocation4 + $0x170] ss:$12 sps:$4 sm:$0xff]  }
 0x131   :  { %1123 = vmatprep.subr.bf16.mxu0 %v3231_v4  ;;  %1893 = vmatprep.subr.bf16.mxu1 %v3234_v5  ;;  %v3306_v4 = vld [vmem:[#allocation4 + $0x168] ss:$12 sps:$4 sm:$0xff]   ;;  %v3310_v5 = vld [vmem:[#allocation4 + $0xb0] ss:$12 sps:$4 sm:$0xff]  }
 0x132   :  { %1923 = vmatprep.mubr.bf16.mxu1 %v3628_v40 }
 0x134   :  { %1124 = vmatpush1.bf16.msra.mxu0 %v3229_v7  ;;  %1894 = vmatpush1.bf16.msra.mxu1 %v3232_v8  ;;  %v3313_v7 = vld [vmem:[#allocation4 + $0x184] ss:$12 sps:$4 sm:$0xff]   ;;  %v3314_v8 = vld [vmem:[#allocation4 + $0x248] ss:$12 sps:$4 sm:$0xff]  }
 0x135   :  { %1125 = vmatprep.subr.bf16.mxu0 %v3237_v9  ;;  %1895 = vmatprep.subr.bf16.mxu1 %v3240_v10  ;;  %v3311_v9 = vld [vmem:[#allocation4 + $0x180] ss:$12 sps:$4 sm:$0xff]   ;;  %v3315_v10 = vld [vmem:[#allocation4 + $0x188] ss:$12 sps:$4 sm:$0xff]  }
 0x138   :  { %1126 = vmatpush1.bf16.msra.mxu0 %v3235_v11  ;;  %1896 = vmatpush1.bf16.msra.mxu1 %v3238_v12  ;;  %v3318_v11 = vld [vmem:[#allocation4 + $0x19c] ss:$12 sps:$4 sm:$0xff]   ;;  %v3319_v12 = vld [vmem:[#allocation4 + $0x260] ss:$12 sps:$4 sm:$0xff]  }
 0x139   :  { %1127 = vmatprep.subr.bf16.mxu0 %v3243_v13  ;;  %1897 = vmatprep.subr.bf16.mxu1 %v3246_v14  ;;  %v3316_v13 = vld [vmem:[#allocation4 + $0x198] ss:$12 sps:$4 sm:$0xff]   ;;  %v3320_v14 = vld [vmem:[#allocation4 + $0x1a0] ss:$12 sps:$4 sm:$0xff]  }
 0x13c   :  { %1128 = vmatpush1.bf16.msra.mxu0 %v3241_v15  ;;  %1898 = vmatpush1.bf16.msra.mxu1 %v3244_v16  ;;  %v3323_v15 = vld [vmem:[#allocation4 + $0x1b4] ss:$12 sps:$4 sm:$0xff]   ;;  %v3324_v16 = vld [vmem:[#allocation4 + $0x278] ss:$12 sps:$4 sm:$0xff]  }
 0x13d   :  { %1129 = vmatprep.subr.bf16.mxu0 %v3249_v17  ;;  %1899 = vmatprep.subr.bf16.mxu1 %v3252_v18  ;;  %v3321_v17 = vld [vmem:[#allocation4 + $0x1b0] ss:$12 sps:$4 sm:$0xff]   ;;  %v3325_v18 = vld [vmem:[#allocation4 + $0x1b8] ss:$12 sps:$4 sm:$0xff]  }
 0x140   :  { %1130 = vmatpush1.bf16.msra.mxu0 %v3247_v19  ;;  %1900 = vmatpush1.bf16.msra.mxu1 %v3250_v20  ;;  %v3328_v19 = vld [vmem:[#allocation4 + $0x1cc] ss:$12 sps:$4 sm:$0xff]   ;;  %v3326_v20 = vld [vmem:[#allocation4 + $0x1c8] ss:$12 sps:$4 sm:$0xff]  }
 0x141   :  { %1131 = vmatprep.subr.bf16.mxu0 %v3255_v21  ;;  %1901 = vmatprep.subr.bf16.mxu1 %v3258_v23  ;;  %v3330_v21 = vld [vmem:[#allocation4 + $0x1d0] ss:$12 sps:$4 sm:$0xff]  }
 0x142   :  { %v3333_v23 = vld [vmem:[#allocation4 + $0x1e4] ss:$12 sps:$4 sm:$0xff]  }
 0x144   :  { %1132 = vmatpush1.bf16.msra.mxu0 %v3253_v26  ;;  %1902 = vmatpush1.bf16.msra.mxu1 %v3256_v27  ;;  %v3334_v26 = vld [vmem:[#allocation4 + $0x2a8] ss:$12 sps:$4 sm:$0xff]   ;;  %v3331_v27 = vld [vmem:[#allocation4 + $0x1e0] ss:$12 sps:$4 sm:$0xff]  }
 0x145   :  { %1133 = vmatprep.subr.bf16.mxu0 %v3261_v28  ;;  %1903 = vmatprep.subr.bf16.mxu1 %v3264_v29  ;;  %v3338_v28 = vld [vmem:[#allocation4 + $0x1fc] ss:$12 sps:$4 sm:$0xff]   ;;  %v3339_v29 = vld [vmem:[#allocation4 + $0x2c0] ss:$12 sps:$4 sm:$0xff]  }
 0x148   :  { %1134 = vmatpush1.bf16.msra.mxu0 %v3259_v30  ;;  %1904 = vmatpush1.bf16.msra.mxu1 %v3262_v31  ;;  %v3336_v30 = vld [vmem:[#allocation4 + $0x1f8] ss:$12 sps:$4 sm:$0xff]   ;;  %v3340_v31 = vld [vmem:[#allocation4 + $0x200] ss:$12 sps:$4 sm:$0xff]  }
 0x149   :  { %1135 = vmatprep.subr.bf16.mxu0 %v3267_v32  ;;  %1905 = vmatprep.subr.bf16.mxu1 %v3270_v33  ;;  %v3343_v32 = vld [vmem:[#allocation4 + $0x214] ss:$12 sps:$4 sm:$0xff]   ;;  %v3344_v33 = vld [vmem:[#allocation4 + $0x2d8] ss:$12 sps:$4 sm:$0xff]  }
 0x14c   :  { %1136 = vmatpush1.bf16.msra.mxu0 %v3265_v34  ;;  %1906 = vmatpush1.bf16.msra.mxu1 %v3268_v35  ;;  %v3341_v34 = vld [vmem:[#allocation4 + $0x210] ss:$12 sps:$4 sm:$0xff]   ;;  %v3345_v35 = vld [vmem:[#allocation4 + $0x218] ss:$12 sps:$4 sm:$0xff]  }
 0x14d   :  { %1907 = vmatprep.subr.bf16.mxu1 %v3273_v37  ;;  %2949 = vmatprep.subr.bf16.mxu0 %v3274_v38  ;;  %v3348_v37 = vld [vmem:[#allocation4 + $0x22c] ss:$12 sps:$4 sm:$0xff]   ;;  %v3349_v38 = vld [vmem:[#allocation4 + $0x2f0] ss:$12 sps:$4 sm:$0xff]  }
 0x14f   :  { %1138 = vmatmul.mubr.bf16.vlgmr.msra.gmra.mrb[8].mxu0 %v3624_v6  ;;  %v3286_v6 = vld [vmem:[#allocation4 + $0x108] ss:$12 sps:$4 sm:$0xff]  }
 0x150   :  { %1908 = vmatpush1.bf16.msra.mxu1 %v3271_v39  ;;  %2950 = vmatpush3.bf16.msra.mxu0 %v3275_v41  ;;  %v3346_v39 = vld [vmem:[#allocation4 + $0x228] ss:$12 sps:$4 sm:$0xff]   ;;  %v3350_v41 = vld [vmem:[#allocation4 + $0x230] ss:$12 sps:$4 sm:$0xff]  }
 0x151   :  { %1909 = vmatprep.subr.bf16.mxu1 %v3278_v42  ;;  %2951 = vmatprep.subr.bf16.mxu0 %v3279_v43  ;;  %v3353_v42 = vld [vmem:[#allocation4 + $0x244] ss:$12 sps:$4 sm:$0xff]   ;;  %v3351_v43 = vld [vmem:[#allocation4 + $0x240] ss:$12 sps:$4 sm:$0xff]  }
 0x152   :  { %2009 = vmatprep.mubr.bf16.mxu0 %v3628_v40  ;;  %v3295_v40 = vld [vmem:[#allocation4 + $0x68] ss:$12 sps:$4 sm:$0xff]  }
 0x154   :  { %1910 = vmatpush1.bf16.msra.mxu1 %v3276_v46  ;;  %2952 = vmatpush3.bf16.msra.mxu0 %v3280_v47  ;;  %v3356_v46 = vld [vmem:[#allocation4 + $0x25c] ss:$12 sps:$4 sm:$0xff]   ;;  %v3354_v47 = vld [vmem:[#allocation4 + $0x258] ss:$12 sps:$4 sm:$0xff]  }
 0x155   :  { %1911 = vmatprep.subr.bf16.mxu1 %v3283_v48  ;;  %2953 = vmatprep.subr.bf16.mxu0 %v3284_v49  ;;  %v3359_v48 = vld [vmem:[#allocation4 + $0x274] ss:$12 sps:$4 sm:$0xff]   ;;  %v3357_v49 = vld [vmem:[#allocation4 + $0x270] ss:$12 sps:$4 sm:$0xff]  }
 0x158   :  { %1912 = vmatpush1.bf16.msra.mxu1 %v3281_v50  ;;  %2954 = vmatpush3.bf16.msra.mxu0 %v3285_v51  ;;  %v3362_v50 = vld [vmem:[#allocation4 + $0x28c] ss:$12 sps:$4 sm:$0xff]   ;;  %v3360_v51 = vld [vmem:[#allocation4 + $0x288] ss:$12 sps:$4 sm:$0xff]  }
 0x159   :  { %1913 = vmatprep.subr.bf16.mxu1 %v3288_v52  ;;  %2955 = vmatprep.subr.bf16.mxu0 %v3289_v53  ;;  %v3365_v52 = vld [vmem:[#allocation4 + $0x2a4] ss:$12 sps:$4 sm:$0xff]   ;;  %v3363_v53 = vld [vmem:[#allocation4 + $0x2a0] ss:$12 sps:$4 sm:$0xff]  }
 0x15c   :  { %1914 = vmatpush1.bf16.msra.mxu1 %v3286_v6  ;;  %2956 = vmatpush3.bf16.msra.mxu0 %v3290_v54  ;;  %v3368_v6 = vld [vmem:[#allocation4 + $0x2bc] ss:$12 sps:$4 sm:$0xff]   ;;  %v3366_v54 = vld [vmem:[#allocation4 + $0x2b8] ss:$12 sps:$4 sm:$0xff]  }
 0x15d   :  { %1915 = vmatprep.subr.bf16.mxu1 %v3293_v55  ;;  %2957 = vmatprep.subr.bf16.mxu0 %v3294_v56  ;;  %v3371_v55 = vld [vmem:[#allocation4 + $0x2d4] ss:$12 sps:$4 sm:$0xff]   ;;  %v3369_v56 = vld [vmem:[#allocation4 + $0x2d0] ss:$12 sps:$4 sm:$0xff]  }
 0x160   :  { %1916 = vmatpush1.bf16.msra.mxu1 %v3291_v57  ;;  %2958 = vmatpush3.bf16.msra.mxu0 %v3295_v40  ;;  %v3374_v57 = vld [vmem:[#allocation4 + $0x2ec] ss:$12 sps:$4 sm:$0xff]   ;;  %v3372_v40 = vld [vmem:[#allocation4 + $0x2e8] ss:$12 sps:$4 sm:$0xff]  }
 0x161   :  { %1917 = vmatprep.subr.bf16.mxu1 %v3298_v58  ;;  %2959 = vmatprep.subr.bf16.mxu0 %v3299_v59  ;;  %v3375_v58 = vld [vmem:[%s3846_s8 + $0x80] sm:$0xff]   ;;  %v3476_v59 = vmov 0.0  }
 0x164   :  { %1918 = vmatpush1.bf16.msra.mxu1 %v3296_v60  ;;  %2960 = vmatpush3.bf16.msra.mxu0 %v3300_v61  ;;  %v3376_v60 = vld [vmem:[%s3846_s8 + $0x88] sm:$0xff]   ;;  %v3377_v61 = vld [vmem:[%s3846_s8 + $0x90] sm:$0xff]  }
 0x165   :  { %1919 = vmatprep.subr.bf16.mxu1 %v3303_v62  ;;  %2961 = vmatprep.subr.bf16.mxu0 %v3304_v63  ;;  %v3379_v62 = vld [vmem:[%s3846_s8 + $0xa0] sm:$0xff]   ;;  %v3380_v63 = vld [vmem:[%s3846_s8 + $0xa8] sm:$0xff]  }
 0x168   :  { %1920 = vmatpush1.bf16.msra.mxu1 %v3301_v0  ;;  %2962 = vmatpush3.bf16.msra.mxu0 %v3305_v1 }
 0x169   :  { %1921 = vmatprep.subr.bf16.mxu1 %v3308_v2  ;;  %2963 = vmatprep.subr.bf16.mxu0 %v3309_v3 }
 0x16c   :  { %1922 = vmatpush1.bf16.msra.mxu1 %v3306_v4  ;;  %2964 = vmatpush3.bf16.msra.mxu0 %v3310_v5  ;;  %v3381_v4 = vld [vmem:[%s3846_s8 + $0xb0] sm:$0xff]  }
 0x16d   :  { %1934 = vmatprep.subr.bf16.mxu1 %v3313_v7  ;;  %2971 = vmatprep.subr.bf16.mxu0 %v3314_v8  ;;  %v3382_v8 = vld [vmem:[%s3846_s8 + $0xb8] sm:$0xff]  }
 0x16f   :  { %1924 = vmatmul.mubr.bf16.vlgmr.msra.gmra.mrb[16].mxu1 %v3626_v36  ;;  %2010 = vmatmul.mubr.bf16.vlgmr.msra.gmra.mrb[12].mxu0 %v3626_v36  ;;  %v3329_v36 = vld [vmem:[#allocation4 + $0x290] ss:$12 sps:$4 sm:$0xff]  }
 0x170   :  { %1935 = vmatpush1.bf16.msra.mxu1 %v3311_v9  ;;  %2972 = vmatpush3.bf16.msra.mxu0 %v3315_v10  ;;  %v3383_v9 = vld [vmem:[%s3846_s8 + $0x40] sm:$0xff]  }
 0x171   :  { %1936 = vmatprep.subr.bf16.mxu1 %v3318_v11  ;;  %2973 = vmatprep.subr.bf16.mxu0 %v3319_v12  ;;  %v3384_v10 = vld [vmem:[%s3846_s8] sm:$0xff]   ;;  %v3386_v11 = vld [vmem:[%s3846_s8 + $0x48] sm:$0xff]  }
 0x172   :  { %2050 = vmatprep.mubr.bf16.mxu0 %v3632_v45  ;;  %1966 = vmatprep.mubr.bf16.mxu1 %v3632_v45  ;;  %v3335_v45 = vld [vmem:[#allocation4 + $0x1e8] ss:$12 sps:$4 sm:$0xff]  }
 0x173   :  { %v3387_v12 = vld [vmem:[%s3846_s8 + $0x8] sm:$0xff]  }
 0x174   :  { %1937 = vmatpush1.bf16.msra.mxu1 %v3316_v13  ;;  %2974 = vmatpush3.bf16.msra.mxu0 %v3320_v14  ;;  %v3389_v13 = vld [vmem:[%s3846_s8 + $0x50] sm:$0xff]  }
 0x175   :  { %1938 = vmatprep.subr.bf16.mxu1 %v3323_v15  ;;  %2975 = vmatprep.subr.bf16.mxu0 %v3324_v16  ;;  %v3390_v14 = vld [vmem:[%s3846_s8 + $0x10] sm:$0xff]   ;;  %v3392_v15 = vld [vmem:[%s3846_s8 + $0x58] sm:$0xff]  }
 0x176   :  { %v3393_v16 = vld [vmem:[%s3846_s8 + $0x18] sm:$0xff]  }
 0x178   :  { %1939 = vmatpush1.bf16.msra.mxu1 %v3321_v17  ;;  %2976 = vmatpush3.bf16.msra.mxu0 %v3325_v18  ;;  %v3395_v17 = vld [vmem:[%s3846_s8 + $0x60] sm:$0xff]  }
 0x179   :  { %1940 = vmatprep.subr.bf16.mxu1 %v3328_v19  ;;  %2977 = vmatprep.subr.bf16.mxu0 %v3329_v36  ;;  %v3396_v18 = vld [vmem:[%s3846_s8 + $0x20] sm:$0xff]   ;;  %v3398_v36 = vld [vmem:[%s3846_s8 + $0x68] sm:$0xff]  }
 0x17a   :  { %v533_v19 = vld [vmem:[%s3843_s5] sm:$0x7] }
 0x17c   :  { %1941 = vmatpush1.bf16.msra.mxu1 %v3326_v20  ;;  %2978 = vmatpush3.bf16.msra.mxu0 %v3330_v21  ;;  %v3399_v20 = vld [vmem:[%s3846_s8 + $0x28] sm:$0xff]   ;;  %v546_v21 = vrot.slane %v533_v19, %v3619_v25 }
 0x17d   :  { %1942 = vmatprep.subr.bf16.mxu1 %v3333_v23  ;;  %2979 = vmatprep.subr.bf16.mxu0 %v3334_v26 }
 0x180   :  { %1943 = vmatpush1.bf16.msra.mxu1 %v3331_v27  ;;  %2980 = vmatpush3.bf16.msra.mxu0 %v3335_v45  ;;  %v3401_v27 = vld [vmem:[%s3846_s8 + $0x70] sm:$0xff]  }
 0x181   :  { %1944 = vmatprep.subr.bf16.mxu1 %v3338_v28  ;;  %2981 = vmatprep.subr.bf16.mxu0 %v3339_v29 }
 0x184   :  { %1945 = vmatpush1.bf16.msra.mxu1 %v3336_v30  ;;  %2982 = vmatpush3.bf16.msra.mxu0 %v3340_v31  ;;  %v3402_v30 = vld [vmem:[%s3846_s8 + $0x30] sm:$0xff]  }
 0x185   :  { %1946 = vmatprep.subr.bf16.mxu1 %v3343_v32  ;;  %2983 = vmatprep.subr.bf16.mxu0 %v3344_v33 }
 0x188   :  { %1947 = vmatpush1.bf16.msra.mxu1 %v3341_v34  ;;  %2984 = vmatpush3.bf16.msra.mxu0 %v3345_v35  ;;  %v3404_v35 = vld [vmem:[%s3846_s8 + $0x78] sm:$0xff]  }
 0x189   :  { %1948 = vmatprep.subr.bf16.mxu1 %v3348_v37  ;;  %2985 = vmatprep.subr.bf16.mxu0 %v3349_v38  ;;  %v3405_v38 = vld [vmem:[%s3846_s8 + $0x38] sm:$0xff]  }
 0x18c   :  { %1949 = vmatpush1.bf16.msra.mxu1 %v3346_v39  ;;  %2986 = vmatpush3.bf16.msra.mxu0 %v3350_v41 }
 0x18d   :  { %1950 = vmatprep.subr.bf16.mxu1 %v3353_v42  ;;  %2993 = vmatprep.subr.bf16.mxu0 %v3383_v9  ;;  %v3407_v42 = vld [vmem:[%s3845_s7 + $0x40] sm:$0xff]  }
 0x18f   :  { %2051 = vmatmul.mubr.bf16.vlgmr.msra.gmra.mrb[16].mxu0 %v3630_v44 }
 0x190   :  { %1951 = vmatpush1.bf16.msra.mxu1 %v3351_v43  ;;  %2994 = vmatpush3.bf16.msra.mxu0 %v3384_v10 }
 0x191   :  { %1952 = vmatprep.subr.bf16.mxu1 %v3356_v46  ;;  %2995 = vmatprep.subr.bf16.mxu0 %v3386_v11  ;;  %v538_v46 = vrot.slane %v533_v19, %v3612_v22 }
 0x194   :  { %1953 = vmatpush1.bf16.msra.mxu1 %v3354_v47  ;;  %2996 = vmatpush3.bf16.msra.mxu0 %v3387_v12  ;;  %v542_v47 = vrot.slane %v533_v19, %v3617_v24  ;;  %v3391_v19 = vld [vmem:[%s3845_s7 + $0x90] sm:$0xff]  }
 0x195   :  { %1954 = vmatprep.subr.bf16.mxu1 %v3359_v48  ;;  %2997 = vmatprep.subr.bf16.mxu0 %v3389_v13 }
 0x198   :  { %1955 = vmatpush1.bf16.msra.mxu1 %v3357_v49  ;;  %2998 = vmatpush3.bf16.msra.mxu0 %v3390_v14 }
 0x199   :  { %1956 = vmatprep.subr.bf16.mxu1 %v3362_v50  ;;  %2999 = vmatprep.subr.bf16.mxu0 %v3392_v15 }
 0x19c   :  { %1957 = vmatpush1.bf16.msra.mxu1 %v3360_v51  ;;  %3000 = vmatpush3.bf16.msra.mxu0 %v3393_v16 }
 0x19d   :  { %1958 = vmatprep.subr.bf16.mxu1 %v3365_v52  ;;  %3001 = vmatprep.subr.bf16.mxu0 %v3395_v17  ;;  %v3385_v17 = vld [vmem:[%s3845_s7 + $0x80] sm:$0xff]  }
 0x1a0   :  { %1959 = vmatpush1.bf16.msra.mxu1 %v3363_v53  ;;  %3002 = vmatpush3.bf16.msra.mxu0 %v3396_v18 }
 0x1a1   :  { %1960 = vmatprep.subr.bf16.mxu1 %v3368_v6  ;;  %3003 = vmatprep.subr.bf16.mxu0 %v3398_v36  ;;  %v3394_v36 = vld [vmem:[%s3845_s7 + $0x98] sm:$0xff]  }
 0x1a4   :  { %1961 = vmatpush1.bf16.msra.mxu1 %v3366_v54  ;;  %3004 = vmatpush3.bf16.msra.mxu0 %v3399_v20  ;;  %v3397_v20 = vld [vmem:[%s3845_s7 + $0xa0] sm:$0xff]  }
 0x1a5   :  { %1962 = vmatprep.subr.bf16.mxu1 %v3371_v55  ;;  %3005 = vmatprep.subr.bf16.mxu0 %v3401_v27 }
 0x1a8   :  { %1963 = vmatpush1.bf16.msra.mxu1 %v3369_v56  ;;  %3006 = vmatpush3.bf16.msra.mxu0 %v3402_v30 }
 0x1a9   :  { %1964 = vmatprep.subr.bf16.mxu1 %v3374_v57  ;;  %3007 = vmatprep.subr.bf16.mxu0 %v3404_v35 }
 0x1ac   :  { %1965 = vmatpush1.bf16.msra.mxu1 %v3372_v40  ;;  %3008 = vmatpush3.bf16.msra.mxu0 %v3405_v38 }
 0x1ad   :  { %3055 = vmatprep.subr.bf16.mxu1 %v3476_v59  ;;  %3024 = vmatprep.subr.bf16.mxu0 %v3407_v42  ;;  %v3408_v42 = vld [vmem:[%s3845_s7] sm:$0xff]  }
 0x1af   :  { %1967 = vmatmul.mubr.bf16.vlgmr.msra.gmra.mrb[16].mxu1 %v3630_v44  ;;  %v3378_v44 = vld [vmem:[%s3846_s8 + $0x98] sm:$0xff]  }
 0x1b0   :  { %3056 = vmatpush3.bf16.msra.mxu1 %v3375_v58  ;;  %3071 = vmatprep.mubr.msk.bf16.mxu1 %vm3477_vm1, %v3476_v59 }
 0x1b1   :  { %3057 = vmatprep.subr.bf16.mxu1 %v3476_v59 }
 0x1b4   :  { %3058 = vmatpush3.bf16.msra.mxu1 %v3376_v60 }
 0x1b5   :  { %3059 = vmatprep.subr.bf16.mxu1 %v3476_v59 }
 0x1b8   :  { %3060 = vmatpush3.bf16.msra.mxu1 %v3377_v61 }
 0x1b9   :  { %3061 = vmatprep.subr.bf16.mxu1 %v3476_v59 }
 0x1bc   :  { %3062 = vmatpush3.bf16.msra.mxu1 %v3378_v44 }
 0x1bd   :  { %3063 = vmatprep.subr.bf16.mxu1 %v3476_v59 }
 0x1c0   :  { %3064 = vmatpush3.bf16.msra.mxu1 %v3379_v62 }
 0x1c1   :  { %3065 = vmatprep.subr.bf16.mxu1 %v3476_v59 }
 0x1c4   :  { %3066 = vmatpush3.bf16.msra.mxu1 %v3380_v63 }
 0x1c5   :  { %3067 = vmatprep.subr.bf16.mxu1 %v3476_v59 }
 0x1c8   :  { %3068 = vmatpush3.bf16.msra.mxu1 %v3381_v4 }
 0x1c9   :  { %3069 = vmatprep.subr.bf16.mxu1 %v3476_v59 }
 0x1cc   :  { %3070 = vmatpush3.bf16.msra.mxu1 %v3382_v8 }
 0x1cd   :  { %3075 = vmatprep.subr.bf16.mxu1 %v3476_v59 }
 0x1e2   :  { %v2921_v0 = vpop.f32.mrb[8].mxu1 }
 0x1e3   :  { %v2922_v1 = vpop.f32.mrb[9].mxu1 }
 0x1e4   :  { %v2923_v2 = vadd.f32 %v2922_v1, %v2921_v0  ;;  %v2924_v3 = vpop.f32.mrb[10].mxu1 }
 0x1e5   :  { %v2925_v5 = vpop.f32.mrb[11].mxu1 }
 0x1e6   :  { %v2926_v7 = vadd.f32 %v2925_v5, %v2924_v3  ;;  %v1183_v45 = vadd.f32 %v2923_v2, %v546_v21  ;;  %v1362_v2 = vld [vmem:[%s3844_s6] sm:$0x7] }
 0x1e7   :  { %v1375_v3 = vrot.slane %v1362_v2, %v3619_v25  ;;  %v3388_v25 = vld [vmem:[%s3845_s7 + $0x88] sm:$0xff]  }
 0x1e8   :  { %v1186_v32 = vadd.f32 %v2926_v7, %v546_v21  ;;  %v1367_v21 = vrot.slane %v1362_v2, %v3612_v22 }
 0x202   :  { %v2943_v23 = vpop.f32.mrb[12].mxu1 }
 0x203   :  { %v2944_v26 = vpop.f32.mrb[13].mxu1 }
 0x204   :  { %v2945_v28 = vadd.f32 %v2944_v26, %v2943_v23  ;;  %v2946_v29 = vpop.f32.mrb[14].mxu1  ;;  %v3400_v23 = vld [vmem:[%s3845_s7 + $0xa8] sm:$0xff]   ;;  %v1371_v26 = vrot.slane %v1362_v2, %v3617_v24  ;;  %v3406_v24 = vld [vmem:[%s3845_s7 + $0xb8] sm:$0xff]  }
 0x205   :  { %v2947_v31 = vpop.f32.mrb[15].mxu1 }
 0x206   :  { %v1224_v33 = vadd.f32 %v2945_v28, %v1183_v45  ;;  %v2948_v34 = vadd.f32 %v2947_v31, %v2946_v29  ;;  %v3403_v29 = vld [vmem:[%s3845_s7 + $0xb0] sm:$0xff]  }
 0x208   :  { %v1227_v37 = vadd.f32 %v2948_v34, %v1186_v32  ;;  %v2061_v39 = vmax.f32 %v1224_v33, 0.0 }
 0x20a   :  { %v2064_v41 = vmax.f32 %v1227_v37, 0.0 }
 0x20c   :  { %v3734_v43 = vpack.c.bf16 %v2064_v41, %v2061_v39 }
 0x222   :  { %v1139_v48 = vpop.f32.mrb[8].mxu0 }
 0x223   :  { %v3095_v49 = vadd.f32 %v1139_v48, %v538_v46  ;;  %v1141_v50 = vpop.f32.mrb[9].mxu0  ;;  %v3412_v48 = vld [vmem:[%s3845_s7 + $0x10] sm:$0xff]  }
 0x224   :  { %v3096_v51 = vadd.f32 %v1141_v50, %v542_v47  ;;  %v1143_v52 = vpop.f32.mrb[10].mxu0  ;;  %v3415_v50 = vld [vmem:[%s3845_s7 + $0x60] sm:$0xff]  }
 0x225   :  { %v3097_v53 = vadd.f32 %v1143_v52, %v538_v46  ;;  %v1145_v6 = vpop.f32.mrb[11].mxu0  ;;  %v2059_v55 = vmax.f32 %v3095_v49, 0.0  ;;  %v3409_v46 = vld [vmem:[%s3845_s7 + $0x48] sm:$0xff]   ;;  %v3414_v49 = vld [vmem:[%s3845_s7 + $0x18] sm:$0xff]  }
 0x226   :  { %v3098_v54 = vadd.f32 %v1145_v6, %v542_v47  ;;  %v2060_v57 = vmax.f32 %v3096_v51, 0.0  ;;  %v3411_v47 = vld [vmem:[%s3845_s7 + $0x50] sm:$0xff]   ;;  %v3416_v51 = vld [vmem:[%s3845_s7 + $0x20] sm:$0xff]   ;;  %v3417_v52 = vld [vmem:[%s3845_s7 + $0x68] sm:$0xff]  }
 0x227   :  { %v2062_v56 = vmax.f32 %v3097_v53, 0.0  ;;  %v3418_v53 = vld [vmem:[%s3845_s7 + $0x28] sm:$0xff]   ;;  %v3419_v6 = vld [vmem:[%s3845_s7 + $0x70] sm:$0xff]  }
 0x228   :  { %v2063_v40 = vmax.f32 %v3098_v54, 0.0  ;;  %v3420_v54 = vld [vmem:[%s3845_s7 + $0x30] sm:$0xff]  }
 0x229   :  { %v3738_v58 = vpack.c.bf16 %v2062_v56, %v2059_v55  ;;  %v3421_v55 = vld [vmem:[%s3845_s7 + $0x78] sm:$0xff]  }
 0x22a   :  { %v3740_v60 = vpack.c.bf16 %v2063_v40, %v2060_v57  ;;  %v3422_v56 = vld [vmem:[%s3845_s7 + $0x38] sm:$0xff]  }
 0x242   :  { %v2965_v61 = vpop.f32.mrb[12].mxu0 }
 0x243   :  { %v2966_v44 = vpop.f32.mrb[13].mxu0 }
 0x244   :  { %v2967_v62 = vadd.f32 %v2966_v44, %v2965_v61  ;;  %v2968_v63 = vpop.f32.mrb[14].mxu0 }
 0x245   :  { %v2969_v0 = vpop.f32.mrb[15].mxu0 }
 0x246   :  { %v2970_v1 = vadd.f32 %v2969_v0, %v2968_v63  ;;  %v2012_v7 = vadd.f32 %v2967_v62, %v1375_v3 }
 0x248   :  { %v2015_v11 = vadd.f32 %v2970_v1, %v1375_v3 }
 0x262   :  { %v2987_v4 = vpop.f32.mrb[16].mxu0 }
 0x263   :  { %v2988_v5 = vpop.f32.mrb[17].mxu0 }
 0x264   :  { %v2989_v8 = vadd.f32 %v2988_v5, %v2987_v4  ;;  %v2990_v9 = vpop.f32.mrb[18].mxu0 }
 0x265   :  { %v2991_v10 = vpop.f32.mrb[19].mxu0 }
 0x266   :  { %v2053_v12 = vadd.f32 %v2989_v8, %v2012_v7  ;;  %v2992_v13 = vadd.f32 %v2991_v10, %v2990_v9 }
 0x268   :  { %v2056_v14 = vadd.f32 %v2992_v13, %v2015_v11  ;;  %v2067_v15 = vmax.f32 %v2053_v12, 0.0 }
 0x26a   :  { %v2070_v16 = vmax.f32 %v2056_v14, 0.0 }
 0x26c   :  { %v2124_v18 = vpack.c.bf16 %v2070_v16, %v2067_v15  ;;  %v2904_v16 = vld [vmem:[%s3847_s9] ss:$0 sm:$0xff] }
 0x26e   :  { %3072 = vmatmul.mubr.bf16.vlgmr.msra.gmra.mrb[20].mxu1 %v2124_v18 }
 0x26f   :  { %3076 = vmatpush3.bf16.msra.mxu1 %v3385_v17  ;;  %3091 = vmatprep.mubr.msk.bf16.mxu1 %vm3477_vm1, %v3476_v59 }
 0x270   :  { %3077 = vmatprep.subr.bf16.mxu1 %v3476_v59 }
 0x273   :  { %3078 = vmatpush3.bf16.msra.mxu1 %v3388_v25 }
 0x274   :  { %3079 = vmatprep.subr.bf16.mxu1 %v3476_v59 }
 0x277   :  { %3080 = vmatpush3.bf16.msra.mxu1 %v3391_v19 }
 0x278   :  { %3081 = vmatprep.subr.bf16.mxu1 %v3476_v59 }
 0x27b   :  { %3082 = vmatpush3.bf16.msra.mxu1 %v3394_v36 }
 0x27c   :  { %3083 = vmatprep.subr.bf16.mxu1 %v3476_v59 }
 0x27f   :  { %3084 = vmatpush3.bf16.msra.mxu1 %v3397_v20 }
 0x280   :  { %3085 = vmatprep.subr.bf16.mxu1 %v3476_v59 }
 0x282   :  { %v1968_v27 = vpop.f32.mrb[16].mxu1 }
 0x283   :  { %v3099_v45 = vadd.f32 %v1968_v27, %v1367_v21  ;;  %3086 = vmatpush3.bf16.msra.mxu1 %v3400_v23  ;;  %v1970_v28 = vpop.f32.mrb[17].mxu1 }
 0x284   :  { %v3100_v30 = vadd.f32 %v1970_v28, %v1371_v26  ;;  %v1972_v31 = vpop.f32.mrb[18].mxu1  ;;  %3087 = vmatprep.subr.bf16.mxu1 %v3476_v59 }
 0x285   :  { %v3101_v22 = vadd.f32 %v1972_v31, %v1367_v21  ;;  %v1974_v32 = vpop.f32.mrb[19].mxu1  ;;  %v2065_v34 = vmax.f32 %v3099_v45, 0.0 }
 0x286   :  { %v3102_v33 = vadd.f32 %v1974_v32, %v1371_v26  ;;  %v2066_v37 = vmax.f32 %v3100_v30, 0.0 }
 0x287   :  { %v2068_v35 = vmax.f32 %v3101_v22, 0.0  ;;  %3088 = vmatpush3.bf16.msra.mxu1 %v3403_v29 }
 0x288   :  { %v2069_v38 = vmax.f32 %v3102_v33, 0.0  ;;  %3089 = vmatprep.subr.bf16.mxu1 %v3476_v59  ;;  %v3410_v59 = vld [vmem:[%s3845_s7 + $0x8] sm:$0xff]  }
 0x289   :  { %v2122_v39 = vpack.c.bf16 %v2068_v35, %v2065_v34 }
 0x28a   :  { %v2123_v41 = vpack.c.bf16 %v2069_v38, %v2066_v37 }
 0x28b   :  { %3090 = vmatpush3.bf16.msra.mxu1 %v3406_v24 }
 0x28c   :  { %2349 = vmatprep.mubr.bf16.mxu0 %v2123_v41 }
 0x28d   :  { %2350 = vmatmul.mubr.bf16.vlgmr.msra.gmra.mrb[20].mxu0 %v2122_v39 }
 0x28e   :  { %3025 = vmatpush3.bf16.msra.mxu0 %v3408_v42  ;;  %3092 = vmatmul.mubr.bf16.vlgmr.msra.gmra.mrb[24].mxu1 %v3734_v43  ;;  %v3413_v43 = vld [vmem:[%s3845_s7 + $0x58] sm:$0xff]  }
 0x28f   :  { %2575 = vmatprep.mubr.bf16.mxu0 %v3740_v60  ;;  %3026 = vmatprep.subr.bf16.mxu0 %v3409_v46 }
 0x292   :  { %3027 = vmatpush3.bf16.msra.mxu0 %v3410_v59 }
 0x293   :  { %3028 = vmatprep.subr.bf16.mxu0 %v3411_v47 }
 0x296   :  { %3029 = vmatpush3.bf16.msra.mxu0 %v3412_v48 }
 0x297   :  { %3030 = vmatprep.subr.bf16.mxu0 %v3413_v43 }
 0x29a   :  { %3031 = vmatpush3.bf16.msra.mxu0 %v3414_v49 }
 0x29b   :  { %3032 = vmatprep.subr.bf16.mxu0 %v3415_v50 }
 0x29e   :  { %3033 = vmatpush3.bf16.msra.mxu0 %v3416_v51 }
 0x29f   :  { %3034 = vmatprep.subr.bf16.mxu0 %v3417_v52 }
 0x2a2   :  { %3035 = vmatpush3.bf16.msra.mxu0 %v3418_v53 }
 0x2a3   :  { %3036 = vmatprep.subr.bf16.mxu0 %v3419_v6 }
 0x2a6   :  { %3037 = vmatpush3.bf16.msra.mxu0 %v3420_v54 }
 0x2a7   :  { %3038 = vmatprep.subr.bf16.mxu0 %v3421_v55 }
 0x2aa   :  { %3039 = vmatpush3.bf16.msra.mxu0 %v3422_v56 }
 0x2ad   :  { %2576 = vmatmul.mubr.bf16.vlgmr.msra.gmra.mrb[24].mxu0 %v3738_v58 }
 0x341   :  { %v2392_v57 = vpop.f32.mrb[20].mxu1 }
 0x342   :  { %v3073_v40 = vpop.f32.mrb[21].mxu1 }
 0x343   :  { %v2395_v60 = vpop.f32.mrb[22].mxu1 }
 0x344   :  { %v3074_v61 = vpop.f32.mrb[23].mxu1 }
 0x360   :  { %v3009_v44 = vpop.f32.mrb[20].mxu0 }
 0x361   :  { %v2618_v62 = vpop.f32.mrb[24].mxu1  ;;  %v3010_v63 = vpop.f32.mrb[21].mxu0 }
 0x362   :  { %v3011_v0 = vadd.f32 %v3010_v63, %v3009_v44  ;;  %v3093_v1 = vpop.f32.mrb[25].mxu1  ;;  %v3012_v2 = vpop.f32.mrb[22].mxu0 }
 0x363   :  { %v2621_v3 = vpop.f32.mrb[26].mxu1  ;;  %v3013_v4 = vpop.f32.mrb[23].mxu0 }
 0x364   :  { %v2393_v5 = vadd.f32 %v3011_v0, %v2392_v57  ;;  %v3014_v7 = vadd.f32 %v3013_v4, %v3012_v2  ;;  %v3094_v8 = vpop.f32.mrb[27].mxu1 }
 0x366   :  { %v2396_v9 = vadd.f32 %v3014_v7, %v2395_v60 }
 0x380   :  { %v3040_v10 = vpop.f32.mrb[24].mxu0 }
 0x381   :  { %v3041_v11 = vpop.f32.mrb[25].mxu0 }
 0x382   :  { %v3042_v12 = vadd.f32 %v3041_v11, %v3040_v10  ;;  %v3043_v58 = vpop.f32.mrb[26].mxu0 }
 0x383   :  { %v3044_v13 = vpop.f32.mrb[27].mxu0 }
 0x384   :  { %v2578_v14 = vadd.f32 %v3042_v12, %v2393_v5  ;;  %v3045_v15 = vadd.f32 %v3044_v13, %v3043_v58 }
 0x386   :  { %v2619_v17 = vadd.f32 %v2618_v62, %v2578_v14  ;;  %v2581_v18 = vadd.f32 %v3045_v15, %v2396_v9 }
 0x388   :  { %v2632_v25 = vadd.f32 %v2904_v16, %v2619_v17  ;;  %v2622_v19 = vadd.f32 %v2621_v3, %v2581_v18 }
 0x38a   :  { %2635 = vst.msk [vmem:[%s3848_s10] sm:$0xff] %vm2634_vm2, %v2632_v25  ;;  %v2633_v36 = vadd.f32 %v2904_v16, %v2622_v19 }
 0x38c   :  { %2636 = vst.msk [vmem:[%s3848_s10 + $0x8] sm:$0xff] %vm2634_vm2, %v2633_v36 }
 0x38d   :  { %2641 = vsyncpa [#allocation3], 1 }
 0x38e   :  { %2642 = vsyncpa [#allocation5], 1 }

</bundles_post_ra>
